<compile_context>
chip_gen: v5e
topology: v5e:2x2
jax: 0.10.0
libtpu: 0.0.40
codegen_flags: <defaults>
</compile_context>

<pallas_src>
import jax
import jax.numpy as jnp
from jax import lax
from jax.experimental import pallas as pl
from jax.experimental.pallas import tpu as pltpu

_LANE = 128    # last-dim tiles must be multiples of the 128-wide lane axis
_SUBLANE = 8   # second-to-last-dim tiles must be multiples of 8 sublanes


def _round_up(x, m):
    return (x + m - 1) // m * m


def _spec(shape, index_map, pipeline_mode=None):
    if pipeline_mode is None:
        return pl.BlockSpec(shape, index_map)
    return pl.BlockSpec(shape, index_map, pipeline_mode=pipeline_mode)


def _mlp_kernel(x_ref, w1_ref, b1_ref, w2_ref, b2_ref, o_ref, acc_ref):
    """One (batch-tile, hidden-tile) step of ReLU(X@W1 + b1) @ W2 + b2."""
    h_idx = pl.program_id(1)

    @pl.when(h_idx == 0)
    def _init():
        acc_ref[...] = jnp.zeros_like(acc_ref)

    # First linear layer on this hidden tile (MXU, f32 accumulate) + bias + ReLU.
    h = jnp.dot(x_ref[...], w1_ref[...], preferred_element_type=jnp.float32)
    h = jnp.maximum(h + b1_ref[...], 0.0)             # (tb, th) + (1, th)

    # Second linear layer: partial contraction over this hidden tile.
    acc_ref[...] += jnp.dot(h.astype(w2_ref.dtype), w2_ref[...],
                            preferred_element_type=jnp.float32)

    @pl.when(h_idx == pl.num_programs(1) - 1)
    def _finalize():
        o_ref[...] = (acc_ref[...] + b2_ref[...]).astype(o_ref.dtype)


def mlp_forward(x, w1, b1, w2, b2, *, block_batch=256, block_hidden=None):
    """Module.forward(X) == net(X) for net = Linear -> ReLU -> Linear."""
    B, D_in = x.shape
    H = w1.shape[1]
    D_out = w2.shape[1]
    assert w1.shape[0] == D_in and w2.shape[0] == H
    b1 = b1.reshape(1, H)
    b2 = b2.reshape(1, D_out)

    # Lane/sublane-aligned zero padding (exact for this MLP: padded features,
    # hidden units and outputs contribute nothing / are sliced off).
    d_in_p = _round_up(D_in, _LANE)
    d_out_p = _round_up(D_out, _LANE)

    tb = _round_up(min(block_batch, _round_up(B, _SUBLANE)), _SUBLANE)
    b_p = _round_up(B, tb)

    if block_hidden is None:
        block_hidden = 1024            # keep per-step weight blocks modest
    th = min(_round_up(block_hidden, _LANE), _round_up(H, _LANE))
    h_p = _round_up(H, th)
    n_h = h_p // th

    xp = jnp.pad(x, ((0, b_p - B), (0, d_in_p - D_in)))
    w1p = jnp.pad(w1, ((0, d_in_p - D_in), (0, h_p - H)))
    b1p = jnp.pad(b1, ((0, 0), (0, h_p - H)))
    w2p = jnp.pad(w2, ((0, h_p - H), (0, d_out_p - D_out)))
    b2p = jnp.pad(b2, ((0, 0), (0, d_out_p - D_out)))

    grid = (b_p // tb, h_p // th)

    def build_and_run(single_buffer_invariant):
        inv = pl.Buffered(1) if single_buffer_invariant else None
        # With a single hidden tile, W1/b1/W2 are grid-invariant -> single
        # buffer them; when tiled over H they stream and stay double-buffered.
        w_mode = inv if n_h == 1 else None
        in_specs = [
            _spec((tb, d_in_p), lambda i, h: (i, 0)),            # X tile
            _spec((d_in_p, th), lambda i, h: (0, h), w_mode),    # W1 tile
            _spec((1, th), lambda i, h: (0, h), w_mode),         # b1 tile
            _spec((th, d_out_p), lambda i, h: (h, 0), w_mode),   # W2 tile
            _spec((1, d_out_p), lambda i, h: (0, 0), inv),       # b2 (invariant)
        ]
        out_spec = _spec((tb, d_out_p), lambda i, h: (i, 0))
        return pl.pallas_call(
            _mlp_kernel,
            out_shape=jax.ShapeDtypeStruct((b_p, d_out_p), x.dtype),
            grid=grid,
            in_specs=in_specs,
            out_specs=out_spec,
            scratch_shapes=[pltpu.VMEM((tb, d_out_p), jnp.float32)],
            compiler_params=pltpu.CompilerParams(
                dimension_semantics=("parallel", "arbitrary"),
                vmem_limit_bytes=48 * 1024 * 1024,
            ),
        )(xp, w1p, b1p, w2p, b2p)

    try:
        out = build_and_run(True)
    except Exception:
        # Fallback if this jax version rejects pl.Buffered(1) on pallas_call
        # inputs; semantics identical, only weight VMEM buffering differs.
        out = build_and_run(False)

    return out[:B, :D_out]


def init_params(key, d_in, hidden, d_out, dtype=jnp.float32):
    """Deterministic nn.Linear-style init: U(-1/sqrt(fan_in), 1/sqrt(fan_in))."""
    k1, k2, k3, k4 = jax.random.split(key, 4)
    lim1 = 1.0 / (d_in ** 0.5)
    lim2 = 1.0 / (hidden ** 0.5)
    w1 = jax.random.uniform(k1, (d_in, hidden), dtype, -lim1, lim1)
    b1 = jax.random.uniform(k2, (1, hidden), dtype, -lim1, lim1)
    w2 = jax.random.uniform(k3, (hidden, d_out), dtype, -lim2, lim2)
    b2 = jax.random.uniform(k4, (1, d_out), dtype, -lim2, lim2)
    return w1, b1, w2, b2


if __name__ == "__main__":
    key = jax.random.PRNGKey(0)
    kx, kp = jax.random.split(key)

    # Deliberately non-128-aligned sizes to exercise the padding path; batch
    # large enough to give two 256-row "parallel" batch tiles.
    B, D_IN, HIDDEN, D_OUT = 512, 72, 200, 48
    x = jax.random.normal(kx, (B, D_IN), jnp.float32)
    w1, b1, w2, b2 = init_params(kp, D_IN, HIDDEN, D_OUT)

    # Default path: one resident hidden tile, single-buffered weights.
    y = jax.block_until_ready(mlp_forward(x, w1, b1, w2, b2))
    # Tiled-hidden path: forces the f32 accumulator across 2 hidden tiles.
    y_tiled = jax.block_until_ready(
        mlp_forward(x, w1, b1, w2, b2, block_hidden=128))

    # Pure-JAX reference check of the fused kernel.
    ref = jnp.maximum(jnp.dot(x, w1, precision=lax.Precision.HIGHEST) + b1, 0.0)
    ref = jnp.dot(ref, w2, precision=lax.Precision.HIGHEST) + b2

    assert y.shape == (B, D_OUT)
    assert jnp.allclose(y, ref, atol=1e-4, rtol=1e-4)
    assert jnp.allclose(y_tiled, ref, atol=1e-4, rtol=1e-4)

    print("KERNEL_OK")
</pallas_src>

<mosaic_0001>
module attributes {stable_mosaic.version = 11 : i64} {
  func.func @_mlp_kernel(%arg0: i32, %arg1: i32, %arg2: memref<256x128xf32, #tpu.memory_space<vmem>>, %arg3: memref<128x256xf32, #tpu.memory_space<vmem>>, %arg4: memref<1x256xf32, #tpu.memory_space<vmem>>, %arg5: memref<256x128xf32, #tpu.memory_space<vmem>>, %arg6: memref<1x128xf32, #tpu.memory_space<vmem>>, %arg7: memref<256x128xf32, #tpu.memory_space<vmem>>, %arg8: memref<256x128xf32, #tpu.memory_space<vmem>>) attributes {dimension_semantics = [#tpu.dimension_semantics<parallel>, #tpu.dimension_semantics<arbitrary>], iteration_bounds = array<i64: 2, 1>, scalar_prefetch = 0 : i64, scratch_operands = 1 : i64, tpu.core_type = #tpu.core_type<tc>, window_params = [{transform_indices = @transform_0, window_bounds = array<i64: 256, 128>}, {pipeline_mode = #tpu.pipeline_mode<synchronous>, transform_indices = @transform_1, window_bounds = array<i64: 128, 256>}, {pipeline_mode = #tpu.pipeline_mode<synchronous>, transform_indices = @transform_2, window_bounds = array<i64: 1, 256>}, {pipeline_mode = #tpu.pipeline_mode<synchronous>, transform_indices = @transform_3, window_bounds = array<i64: 256, 128>}, {pipeline_mode = #tpu.pipeline_mode<synchronous>, transform_indices = @transform_4, window_bounds = array<i64: 1, 128>}, {transform_indices = @transform_5, window_bounds = array<i64: 256, 128>}]} {
    %c0_i32 = arith.constant 0 : i32
    %0 = arith.cmpi eq, %arg1, %c0_i32 : i32
    %1 = arith.extui %0 : i1 to i32
    %c0_i32_0 = arith.constant 0 : i32
    %2 = arith.cmpi ne, %1, %c0_i32_0 : i32
    scf.if %2 {
      %cst_16 = arith.constant 0.000000e+00 : f32
      %19 = vector.broadcast %cst_16 : f32 to vector<256x128xf32>
      %c0_17 = arith.constant 0 : index
      %c0_18 = arith.constant 0 : index
      %20 = vector.load %arg8[%c0_17, %c0_18] : memref<256x128xf32, #tpu.memory_space<vmem>>, vector<256x128xf32>
      tpu.vector_store %arg8[%c0_17, %c0_18], %19 {strides = array<i32>} : memref<256x128xf32, #tpu.memory_space<vmem>>, vector<256x128xf32>,
    } else {
    }
    %c0 = arith.constant 0 : index
    %c0_1 = arith.constant 0 : index
    %3 = vector.load %arg2[%c0, %c0_1] : memref<256x128xf32, #tpu.memory_space<vmem>>, vector<256x128xf32>
    %c0_2 = arith.constant 0 : index
    %c0_3 = arith.constant 0 : index
    %4 = vector.load %arg3[%c0_2, %c0_3] : memref<128x256xf32, #tpu.memory_space<vmem>>, vector<128x256xf32>
    %cst = arith.constant dense<0.000000e+00> : vector<256x256xf32>
    %5 = tpu.matmul %3, %4, %cst {dimension_numbers = #tpu.dot_dimension_numbers<[1], [0], [0], [1], [0, 0, 1, 1], [], []>} : vector<256x128xf32>, vector<128x256xf32>, vector<256x256xf32> -> vector<256x256xf32>
    %c0_4 = arith.constant 0 : index
    %c0_5 = arith.constant 0 : index
    %6 = vector.load %arg4[%c0_4, %c0_5] : memref<1x256xf32, #tpu.memory_space<vmem>>, vector<1x256xf32>
    %7 = vector.broadcast %6 : vector<1x256xf32> to vector<256x256xf32>
    %8 = arith.addf %5, %7 : vector<256x256xf32>
    %cst_6 = arith.constant 0.000000e+00 : f32
    %9 = vector.broadcast %cst_6 : f32 to vector<256x256xf32>
    %10 = arith.maximumf %8, %9 : vector<256x256xf32>
    %c0_7 = arith.constant 0 : index
    %c0_8 = arith.constant 0 : index
    %11 = vector.load %arg8[%c0_7, %c0_8] : memref<256x128xf32, #tpu.memory_space<vmem>>, vector<256x128xf32>
    %c0_9 = arith.constant 0 : index
    %c0_10 = arith.constant 0 : index
    %12 = vector.load %arg5[%c0_9, %c0_10] : memref<256x128xf32, #tpu.memory_space<vmem>>, vector<256x128xf32>
    %cst_11 = arith.constant dense<0.000000e+00> : vector<256x128xf32>
    %13 = tpu.matmul %10, %12, %cst_11 {dimension_numbers = #tpu.dot_dimension_numbers<[1], [0], [0], [1], [0, 0, 1, 1], [], []>} : vector<256x256xf32>, vector<256x128xf32>, vector<256x128xf32> -> vector<256x128xf32>
    %14 = arith.addf %11, %13 : vector<256x128xf32>
    %c0_12 = arith.constant 0 : index
    %c0_13 = arith.constant 0 : index
    %15 = vector.load %arg8[%c0_12, %c0_13] : memref<256x128xf32, #tpu.memory_space<vmem>>, vector<256x128xf32>
    tpu.vector_store %arg8[%c0_12, %c0_13], %14 {strides = array<i32>} : memref<256x128xf32, #tpu.memory_space<vmem>>, vector<256x128xf32>,
    %c0_i32_14 = arith.constant 0 : i32
    %16 = arith.cmpi eq, %arg1, %c0_i32_14 : i32
    %17 = arith.extui %16 : i1 to i32
    %c0_i32_15 = arith.constant 0 : i32
    %18 = arith.cmpi ne, %17, %c0_i32_15 : i32
    scf.if %18 {
      %c0_16 = arith.constant 0 : index
      %c0_17 = arith.constant 0 : index
      %19 = vector.load %arg8[%c0_16, %c0_17] : memref<256x128xf32, #tpu.memory_space<vmem>>, vector<256x128xf32>
      %c0_18 = arith.constant 0 : index
      %c0_19 = arith.constant 0 : index
      %20 = vector.load %arg6[%c0_18, %c0_19] : memref<1x128xf32, #tpu.memory_space<vmem>>, vector<1x128xf32>
      %21 = vector.broadcast %20 : vector<1x128xf32> to vector<256x128xf32>
      %22 = arith.addf %19, %21 : vector<256x128xf32>
      %c0_20 = arith.constant 0 : index
      %c0_21 = arith.constant 0 : index
      %23 = vector.load %arg7[%c0_20, %c0_21] : memref<256x128xf32, #tpu.memory_space<vmem>>, vector<256x128xf32>
      tpu.vector_store %arg7[%c0_20, %c0_21], %22 {strides = array<i32>} : memref<256x128xf32, #tpu.memory_space<vmem>>, vector<256x128xf32>,
    } else {
    }
    return
  }
  func.func @transform_0(%arg0: i32, %arg1: i32) -> (i32, i32) {
    %c0_i32 = arith.constant 0 : i32
    %c0_i32_0 = arith.constant 0 : i32
    return %arg0, %c0_i32 : i32, i32
  }
  func.func @transform_1(%arg0: i32, %arg1: i32) -> (i32, i32) {
    %c0_i32 = arith.constant 0 : i32
    %c0_i32_0 = arith.constant 0 : i32
    return %c0_i32, %arg1 : i32, i32
  }
  func.func @transform_2(%arg0: i32, %arg1: i32) -> (i32, i32) {
    %c0_i32 = arith.constant 0 : i32
    %c0_i32_0 = arith.constant 0 : i32
    return %c0_i32, %arg1 : i32, i32
  }
  func.func @transform_3(%arg0: i32, %arg1: i32) -> (i32, i32) {
    %c0_i32 = arith.constant 0 : i32
    %c0_i32_0 = arith.constant 0 : i32
    return %arg1, %c0_i32 : i32, i32
  }
  func.func @transform_4(%arg0: i32, %arg1: i32) -> (i32, i32) {
    %c0_i32 = arith.constant 0 : i32
    %c0_i32_0 = arith.constant 0 : i32
    %c0_i32_1 = arith.constant 0 : i32
    return %c0_i32, %c0_i32_0 : i32, i32
  }
  func.func @transform_5(%arg0: i32, %arg1: i32) -> (i32, i32) {
    %c0_i32 = arith.constant 0 : i32
    %c0_i32_0 = arith.constant 0 : i32
    return %arg0, %c0_i32 : i32, i32
  }
}

module attributes {stable_mosaic.version = 11 : i64} {
  func.func @_mlp_kernel(%arg0: i32, %arg1: i32, %arg2: memref<256x128xf32, #tpu.memory_space<vmem>>, %arg3: memref<128x256xf32, #tpu.memory_space<vmem>>, %arg4: memref<1x256xf32, #tpu.memory_space<vmem>>, %arg5: memref<256x128xf32, #tpu.memory_space<vmem>>, %arg6: memref<1x128xf32, #tpu.memory_space<vmem>>, %arg7: memref<256x128xf32, #tpu.memory_space<vmem>>, %arg8: memref<256x128xf32, #tpu.memory_space<vmem>>) attributes {dimension_semantics = [#tpu.dimension_semantics<parallel>, #tpu.dimension_semantics<arbitrary>], iteration_bounds = array<i64: 2, 1>, scalar_prefetch = 0 : i64, scratch_operands = 1 : i64, tpu.core_type = #tpu.core_type<tc>, window_params = [{transform_indices = @transform_0, window_bounds = array<i64: 256, 128>}, {transform_indices = @transform_1, window_bounds = array<i64: 128, 256>}, {transform_indices = @transform_2, window_bounds = array<i64: 1, 256>}, {transform_indices = @transform_3, window_bounds = array<i64: 256, 128>}, {pipeline_mode = #tpu.pipeline_mode<synchronous>, transform_indices = @transform_4, window_bounds = array<i64: 1, 128>}, {transform_indices = @transform_5, window_bounds = array<i64: 256, 128>}]} {
    %c0_i32 = arith.constant 0 : i32
    %0 = arith.cmpi eq, %arg1, %c0_i32 : i32
    %1 = arith.extui %0 : i1 to i32
    %c0_i32_0 = arith.constant 0 : i32
    %2 = arith.cmpi ne, %1, %c0_i32_0 : i32
    scf.if %2 {
      %cst_16 = arith.constant 0.000000e+00 : f32
      %19 = vector.broadcast %cst_16 : f32 to vector<256x128xf32>
      %c0_17 = arith.constant 0 : index
      %c0_18 = arith.constant 0 : index
      %20 = vector.load %arg8[%c0_17, %c0_18] : memref<256x128xf32, #tpu.memory_space<vmem>>, vector<256x128xf32>
      tpu.vector_store %arg8[%c0_17, %c0_18], %19 {strides = array<i32>} : memref<256x128xf32, #tpu.memory_space<vmem>>, vector<256x128xf32>,
    } else {
    }
    %c0 = arith.constant 0 : index
    %c0_1 = arith.constant 0 : index
    %3 = vector.load %arg2[%c0, %c0_1] : memref<256x128xf32, #tpu.memory_space<vmem>>, vector<256x128xf32>
    %c0_2 = arith.constant 0 : index
    %c0_3 = arith.constant 0 : index
    %4 = vector.load %arg3[%c0_2, %c0_3] : memref<128x256xf32, #tpu.memory_space<vmem>>, vector<128x256xf32>
    %cst = arith.constant dense<0.000000e+00> : vector<256x256xf32>
    %5 = tpu.matmul %3, %4, %cst {dimension_numbers = #tpu.dot_dimension_numbers<[1], [0], [0], [1], [0, 0, 1, 1], [], []>} : vector<256x128xf32>, vector<128x256xf32>, vector<256x256xf32> -> vector<256x256xf32>
    %c0_4 = arith.constant 0 : index
    %c0_5 = arith.constant 0 : index
    %6 = vector.load %arg4[%c0_4, %c0_5] : memref<1x256xf32, #tpu.memory_space<vmem>>, vector<1x256xf32>
    %7 = vector.broadcast %6 : vector<1x256xf32> to vector<256x256xf32>
    %8 = arith.addf %5, %7 : vector<256x256xf32>
    %cst_6 = arith.constant 0.000000e+00 : f32
    %9 = vector.broadcast %cst_6 : f32 to vector<256x256xf32>
    %10 = arith.maximumf %8, %9 : vector<256x256xf32>
    %c0_7 = arith.constant 0 : index
    %c0_8 = arith.constant 0 : index
    %11 = vector.load %arg8[%c0_7, %c0_8] : memref<256x128xf32, #tpu.memory_space<vmem>>, vector<256x128xf32>
    %c0_9 = arith.constant 0 : index
    %c0_10 = arith.constant 0 : index
    %12 = vector.load %arg5[%c0_9, %c0_10] : memref<256x128xf32, #tpu.memory_space<vmem>>, vector<256x128xf32>
    %cst_11 = arith.constant dense<0.000000e+00> : vector<256x128xf32>
    %13 = tpu.matmul %10, %12, %cst_11 {dimension_numbers = #tpu.dot_dimension_numbers<[1], [0], [0], [1], [0, 0, 1, 1], [], []>} : vector<256x256xf32>, vector<256x128xf32>, vector<256x128xf32> -> vector<256x128xf32>
    %14 = arith.addf %11, %13 : vector<256x128xf32>
    %c0_12 = arith.constant 0 : index
    %c0_13 = arith.constant 0 : index
    %15 = vector.load %arg8[%c0_12, %c0_13] : memref<256x128xf32, #tpu.memory_space<vmem>>, vector<256x128xf32>
    tpu.vector_store %arg8[%c0_12, %c0_13], %14 {strides = array<i32>} : memref<256x128xf32, #tpu.memory_space<vmem>>, vector<256x128xf32>,
    %c0_i32_14 = arith.constant 0 : i32
    %16 = arith.cmpi eq, %arg1, %c0_i32_14 : i32
    %17 = arith.extui %16 : i1 to i32
    %c0_i32_15 = arith.constant 0 : i32
    %18 = arith.cmpi ne, %17, %c0_i32_15 : i32
    scf.if %18 {
      %c0_16 = arith.constant 0 : index
      %c0_17 = arith.constant 0 : index
      %19 = vector.load %arg8[%c0_16, %c0_17] : memref<256x128xf32, #tpu.memory_space<vmem>>, vector<256x128xf32>
      %c0_18 = arith.constant 0 : index
      %c0_19 = arith.constant 0 : index
      %20 = vector.load %arg6[%c0_18, %c0_19] : memref<1x128xf32, #tpu.memory_space<vmem>>, vector<1x128xf32>
      %21 = vector.broadcast %20 : vector<1x128xf32> to vector<256x128xf32>
      %22 = arith.addf %19, %21 : vector<256x128xf32>
      %c0_20 = arith.constant 0 : index
      %c0_21 = arith.constant 0 : index
      %23 = vector.load %arg7[%c0_20, %c0_21] : memref<256x128xf32, #tpu.memory_space<vmem>>, vector<256x128xf32>
      tpu.vector_store %arg7[%c0_20, %c0_21], %22 {strides = array<i32>} : memref<256x128xf32, #tpu.memory_space<vmem>>, vector<256x128xf32>,
    } else {
    }
    return
  }
  func.func @transform_0(%arg0: i32, %arg1: i32) -> (i32, i32) {
    %c0_i32 = arith.constant 0 : i32
    %c0_i32_0 = arith.constant 0 : i32
    return %arg0, %c0_i32 : i32, i32
  }
  func.func @transform_1(%arg0: i32, %arg1: i32) -> (i32, i32) {
    %c0_i32 = arith.constant 0 : i32
    %c0_i32_0 = arith.constant 0 : i32
    return %c0_i32, %arg1 : i32, i32
  }
  func.func @transform_2(%arg0: i32, %arg1: i32) -> (i32, i32) {
    %c0_i32 = arith.constant 0 : i32
    %c0_i32_0 = arith.constant 0 : i32
    return %c0_i32, %arg1 : i32, i32
  }
  func.func @transform_3(%arg0: i32, %arg1: i32) -> (i32, i32) {
    %c0_i32 = arith.constant 0 : i32
    %c0_i32_0 = arith.constant 0 : i32
    return %arg1, %c0_i32 : i32, i32
  }
  func.func @transform_4(%arg0: i32, %arg1: i32) -> (i32, i32) {
    %c0_i32 = arith.constant 0 : i32
    %c0_i32_0 = arith.constant 0 : i32
    %c0_i32_1 = arith.constant 0 : i32
    return %c0_i32, %c0_i32_0 : i32, i32
  }
  func.func @transform_5(%arg0: i32, %arg1: i32) -> (i32, i32) {
    %c0_i32 = arith.constant 0 : i32
    %c0_i32_0 = arith.constant 0 : i32
    return %arg0, %c0_i32 : i32, i32
  }
}

</mosaic_0001>

<bundles_post_ra>
// kernel: tpu_custom_call.1
= control target key start
LH: loop header
LB: loop body
LE: loop exit
PB: predicated region body
PF: predicated region fallthrough
CT: control target
= control target key end

     0   :  { %s2047_s0 = inlined_call_operand.hbm [shape: f32[512,128], index: 0, kind: input, shape index: {}]   ;;  %s2048_s1 = inlined_call_operand.hbm [shape: f32[128,256], index: 1, kind: input, shape index: {}]   ;;  %s2049_s2 = inlined_call_operand.hbm [shape: f32[1,256], index: 2, kind: input, shape index: {}]   ;;  %s2050_s3 = inlined_call_operand.hbm [shape: f32[256,128], index: 3, kind: input, shape index: {}]   ;;  %s2051_s4 = inlined_call_operand.vmem [shape: f32[1,128], index: 4, kind: input, shape index: {}]   ;;  %s2052_s5 = inlined_call_operand.hbm [shape: f32[512,128], index: 5, kind: output, shape index: {}]  }
   0x1   :  { %2055 = sst [smem:[#allocation16_spill]] %s2048_s1 }
   0x2   :  { %2056 = sst [smem:[#allocation17_spill]] %s2049_s2 }
   0x3   :  { %2057 = sst [smem:[#allocation18_spill]] %s2050_s3 }
   0x4   :  { %10 = vsyncpa [#allocation4], 0 }
   0x5   :  { %12 = vsyncpa [#allocation4 + $0x1], 0 }
   0x6   :  { %13 = vsyncpa [#allocation7], 0 }
   0x7   :  { %14 = vsyncpa [#allocation10], 0 }
   0x8   :  { %15 = vsyncpa [#allocation5], 0 }
   0x9   :  { %17 = vsyncpa [#allocation5 + $0x1], 0  ;;  %s1692_s18 = smov 0   ;;  %s1694_s19 = smov 0  }
   0xa   :  { %s1696_s20 = smov 0   ;;  %s1698_s21 = smov 0  }
   0xb   :  { %s1700_s22 = smov 0   ;;  %s1702_s23 = smov 0  }
   0xc LB: > { %s1318_s24 = sadd.s32 4294967295, %s1651_s23   ;;  %s1319_s25 = sadd.s32 4294967294, %s1651_s23   ;;  %s1651_s23 = sphi %s1702_s23, %s23_s23   ;;  %s1647_s22 = sphi %s1700_s22, %s2075_s22   ;;  %s1643_s21 = sphi %s1698_s21, %s2074_s21   ;;  %s1639_s20 = sphi %s1696_s20, %s2073_s20   ;;  %s1635_s19 = sphi %s1694_s19, %s2072_s19   ;;  %s1631_s18 = sphi %s1692_s18, %s2071_s18  }
   0xd   : > { %p55_p0 = scmp.ne.s32.totalorder %s1635_s19, %s1631_s18  ;;  %p1726_p1 = scmp.eq.s32.totalorder %s1318_s24, 0 }
   0xe   : > { %p1730_p2 = scmp.eq.s32.totalorder %s1318_s24, 1  ;;  %p184_p3 = scmp.eq.s32.totalorder %s1319_s25, 1 }
   0xf   : > { %p1736_p4 = por %p1726_p1, %p55_p0  ;;  %p1320_p5 = scmp.ge.s32.totalorder %s1651_s23, 1 }
  0x10   : > { %p1741_p6 = por %p184_p3, %p55_p0  ;;  %p191_p7 = scmp.lt.s32.totalorder %s1651_s23, 3 }
  0x11   : > { %s2062_s1 = sld [smem:[#allocation16_spill]]  ;;  %s1653_s9 = smov [#allocation6]  }
  0x12   : > { %p1749_p8 = pnand %p1320_p5, %p191_p7  ;;  %s207_s10 = sshll.u32 %s1653_s9, 4  ;;  %s208_s10 = int_to_ptr.vmem [resolvable:$true] %s207_s10 }
  0x13   : > { %p1324_p11 = scmp.ge.s32.totalorder %s1651_s23, 2  ;;  %s2065_s2 = sld [smem:[#allocation17_spill]] }
  0x14   : > { %p1357_p9 = pneg %p1749_p8  ;;  %s1654_s15 = smov 256  }
  0x15   : > { %s1655_s16 = smov 16   ;;  %s1656_s17 = smov [#allocation8]  }
  0x16   : > { %p1757_p10 = pnand %p1357_p9, %p1726_p1  ;;  %s224_s24 = sshll.u32 %s1656_s17, 4  ;;  %s225_s24 = int_to_ptr.vmem [resolvable:$true] %s224_s24 }
  0x17   : > { %s205_s7 = sshll.u32 %s2062_s1, 4  ;;  %s2066_s3 = sld [smem:[#allocation18_spill]]  ;;  %s206_s7 = int_to_ptr.hbm [resolvable:$true] %s205_s7 }
  0x18   : > { %1360 = dma.hbm_to_vmem [thread:$0]  (!%p1757_p10), %s206_s7, 4096, %s208_s10, [#allocation7], %s1654_s15, %s1654_s15, %s1655_s16  }
  0x19   : > { %s222_s14 = sshll.u32 %s2065_s2, 4  ;;  %s1657_s9 = smov [#allocation9]   ;;  %s223_s14 = int_to_ptr.hbm [resolvable:$true] %s222_s14 }
  0x1a   : > { %1363 = dma.hbm_to_vmem [thread:$0]  (!%p1757_p10), %s223_s14, 32, %s225_s24, [#allocation7]  }
  0x1b   : > { %s238_s12 = sshll.u32 %s1657_s9, 4  ;;  %s2053_s13 = smov 128   ;;  %s239_s12 = int_to_ptr.vmem [resolvable:$true] %s238_s12 }
  0x1c   : > { %s2054_s7 = smov 8   ;;  %s42_s10 = sadd.s32 1, %s1639_s20 }
  0x1d   : > { %s236_s6 = sshll.u32 %s2066_s3, 4  ;;  %s35_s15 = sadd.s32 1, %s1647_s22  ;;  %s237_s6 = int_to_ptr.hbm [resolvable:$true] %s236_s6 }
  0x1e   : > { %1366 = dma.hbm_to_vmem [thread:$0]  (!%p1757_p10), %s237_s6, 4096, %s239_s12, [#allocation10], %s2053_s13, %s2053_s13, %s2054_s7  }
  0x1f   : > { %p49_p12 = scmp.ne.s32.totalorder %s1639_s20, %s1635_s19  ;;  %p37_p13 = scmp.ge.s32.totalorder %s35_s15, 2 }
  0x20   : > { %p50_p0 = scmp.eq.s32.totalorder %s1651_s23, 0  ;;  %p1378_p5 = scmp.lt.s32.totalorder %s1651_s23, 2 }
  0x21   : > { %p1784_p3 = por %p1730_p2, %p49_p12  ;;  %s2077_s15 = smov (%p37_p13, %s35_s15), 0 }
  0x22   : > { %p1791_p7 = por %p50_p0, %p49_p12  ;;  %s255_s16 = sand.u32 1, %s1639_s20  }
  0x23   : > { %s39_s17 = ssub.s32 %s1647_s22, %s2077_s15  ;;  %s1325_s24 = sshll.u32 %s255_s16, 8 }
  0x24   : > { %p40_p9 = scmp.eq.s32.totalorder %s39_s17, 0  ;;  %s1339_s25 = sshll.u32 %s1647_s22, 8 }
  0x25   : > { %s264_s9 = scalar_lea.hbm %s2047_s0, %s1339_s25  ;;  %s259_s12 = scalar_lea.vmem [#allocation3], %s1325_s24 }
  0x26   : > { %s1800_s27 = scalar_select %p40_p9, %s1639_s20, %s42_s10  }
  0x27   : > { %s267_s13 = sshll.u32 %s259_s12, 4  ;;  %s265_s7 = sshll.u32 %s264_s9, 4  ;;  %s268_s13 = int_to_ptr.vmem [resolvable:$true] %s267_s13  ;;  %s266_s7 = int_to_ptr.hbm [resolvable:$true] %s265_s7 }
  0x28   : > { %p1368_p2 = pnand %p1378_p5, %p1791_p7  ;;  %s256_s1 = scalar_lea.sflag [#allocation4], %s255_s16 }
  0x29   : > { %s2069_s2 = smov 8   ;;  %s2070_s3 = smov 128  }
  0x2a   : > { %1370 = dma.hbm_to_vmem [thread:$0]  (!%p1368_p2), %s266_s7, 4096, %s268_s13, %s256_s1, %s2070_s3, %s2070_s3, %s2069_s2  }
  0x2b   : > { %279 = sbr.rel (%p1749_p8) target bundleno = 604 (0x25c), region = 40  ;;  %s1815_s10 = sand.u32 (!%p1749_p8), 1, %s1635_s19  }
  0x2c   : > { %s1329_s17 = sshll.u32 (!%p1749_p8), %s1815_s10, 8  ;;  %s282_s24 = scalar_lea.sflag (!%p1749_p8), [#allocation4], %s1815_s10 }
  0x2d   : > { %s1821_s11 = scalar_lea.vmem (!%p1749_p8), [#allocation3], %s1329_s17 }
  0x30   : > { %1614 = dma.done.wait (%p1736_p4), %s282_s24, 4096  }
  0x31   : > { %1616 = vsyncadd (%p1736_p4), %s282_s24, 4294963200 }
  0x32   : > { %1618 = dma.done.wait (%p1726_p1), [#allocation7], 4128  }
  0x33   : > { %1620 = vsyncadd (%p1726_p1), [#allocation7], 4294963168 }
  0x34   : > { %1622 = dma.done.wait (%p1726_p1), [#allocation10], 4096  }
  0x35   : > { %1624 = vsyncadd (%p1726_p1), [#allocation10], 4294963200  ;;  %v431_v0 = vld [vmem:[#allocation6 + $0xf0] sm:$0xff]  ;;  %v432_v1 = vld [vmem:[#allocation6 + $0xf8] sm:$0xff]  ;;  %s1915_s3 = scalar_lea.vmem [#allocation11], %s1329_s17  ;;  %s1340_s26 = sshll.u32 %s1643_s21, 8 }
  0x36   : > { %v429_v2 = vld [vmem:[#allocation6 + $0xe0] sm:$0xff]  ;;  %439 = vmatpush.msra.mxu0 %v431_v0  ;;  %552 = vmatpush.msra.mxu1 %v432_v1  ;;  %v430_v3 = vld [vmem:[#allocation6 + $0xe8] sm:$0xff]  ;;  %v427_v4 = vld [vmem:[#allocation6 + $0xd0] sm:$0xff]  ;;  %s1198_s13 = scalar_lea.hbm %s2052_s5, %s1340_s26  ;;  %s1199_s7 = sshll.u32 %s1915_s3, 4  ;;  %s1200_s7 = int_to_ptr.vmem [resolvable:$true] %s1199_s7 }
  0x37   : > { %v428_v5 = vld [vmem:[#allocation6 + $0xd8] sm:$0xff]  ;;  %v425_v6 = vld [vmem:[#allocation6 + $0xc0] sm:$0xff]  ;;  %v426_v7 = vld [vmem:[#allocation6 + $0xc8] sm:$0xff]  ;;  %s1201_s16 = sshll.u32 %s1198_s13, 4  ;;  %s1187_s25 = scalar_lea.sflag [#allocation5], %s1815_s10  ;;  %s1202_s16 = int_to_ptr.hbm [resolvable:$true] %s1201_s16 }
  0x38   : > { %440 = vmatpush.msra.mxu0 %v429_v2  ;;  %553 = vmatpush.msra.mxu1 %v430_v3  ;;  %v423_v8 = vld [vmem:[#allocation6 + $0xb0] sm:$0xff]  ;;  %v424_v9 = vld [vmem:[#allocation6 + $0xb8] sm:$0xff]  ;;  %v421_v10 = vld [vmem:[#allocation6 + $0xa0] sm:$0xff]  ;;  %s1575_s21 = sshra.s32 %s1202_s16, 4  ;;  %s1581_s12 = scalar_lea.hbm %s2052_s5, 512  ;;  %s1576_s21 = int_to_ptr.hbm [resolvable:$true] %s1575_s21 }
  0x39   : > { %v422_v11 = vld [vmem:[#allocation6 + $0xa8] sm:$0xff]  ;;  %v419_v12 = vld [vmem:[#allocation6 + $0x90] sm:$0xff]  ;;  %v420_v13 = vld [vmem:[#allocation6 + $0x98] sm:$0xff]  ;;  %s1577_s30 = scalar_lea.hbm %s1576_s21, 256  ;;  %p1582_p10 = scmp.lt.s32.totalorder %s1576_s21, %s2052_s5 }
  0x3a   : > { %441 = vmatpush.msra.mxu0 %v427_v4  ;;  %554 = vmatpush.msra.mxu1 %v428_v5  ;;  %v417_v14 = vld [vmem:[#allocation6 + $0x80] sm:$0xff]  ;;  %v418_v15 = vld [vmem:[#allocation6 + $0x88] sm:$0xff]  ;;  %v415_v16 = vld [vmem:[#allocation6 + $0x70] sm:$0xff]  ;;  %p1578_p1 = scmp.ne.s32.totalorder %s1576_s21, %s1577_s30  ;;  %p1583_p12 = scmp.lt.s32.totalorder %s1581_s12, %s1577_s30 }
  0x3b   : > { %v416_v17 = vld [vmem:[#allocation6 + $0x78] sm:$0xff]  ;;  %v413_v18 = vld [vmem:[#allocation6 + $0x60] sm:$0xff]  ;;  %v414_v19 = vld [vmem:[#allocation6 + $0x68] sm:$0xff] }
  0x3c   : > { %442 = vmatpush.msra.mxu0 %v425_v6  ;;  %555 = vmatpush.msra.mxu1 %v426_v7  ;;  %v411_v20 = vld [vmem:[#allocation6 + $0x50] sm:$0xff]  ;;  %v412_v21 = vld [vmem:[#allocation6 + $0x58] sm:$0xff]  ;;  %v409_v22 = vld [vmem:[#allocation6 + $0x40] sm:$0xff]  ;;  %p1579_p4 = pnand %p1578_p1, %p1784_p3  ;;  %p1584_p13 = por %p1583_p12, %p1582_p10 }
  0x3d   : > { %v410_v23 = vld [vmem:[#allocation6 + $0x48] sm:$0xff]  ;;  %v407_v24 = vld [vmem:[#allocation6 + $0x30] sm:$0xff]  ;;  %v408_v25 = vld [vmem:[#allocation6 + $0x38] sm:$0xff] }
  0x3e   : > { %443 = vmatpush.msra.mxu0 %v423_v8  ;;  %556 = vmatpush.msra.mxu1 %v424_v9  ;;  %v405_v26 = vld [vmem:[#allocation6 + $0x20] sm:$0xff]  ;;  %v406_v27 = vld [vmem:[#allocation6 + $0x28] sm:$0xff]  ;;  %v403_v28 = vld [vmem:[#allocation6 + $0x10] sm:$0xff]  ;;  %p1580_p8 = pneg %p1579_p4 }
  0x3f   : > { %v404_v29 = vld [vmem:[#allocation6 + $0x18] sm:$0xff]  ;;  %v401_v30 = vld [vmem:[#allocation6] sm:$0xff]  ;;  %v402_v31 = vld [vmem:[#allocation6 + $0x8] sm:$0xff] }
  0x40   : > { %444 = vmatpush.msra.mxu0 %v421_v10  ;;  %557 = vmatpush.msra.mxu1 %v422_v11  ;;  %v369_v32 = vld [vmem:[%s1821_s11] sm:$0xff]  ;;  %v370_v33 = vld [vmem:[%s1821_s11 + $0x8] sm:$0xff]  ;;  %v371_v34 = vld [vmem:[%s1821_s11 + $0x10] sm:$0xff]  ;;  %p1585_p0 = pnand %p1584_p13, %p1580_p8 }
  0x41   : > { %v372_v35 = vld [vmem:[%s1821_s11 + $0x18] sm:$0xff]  ;;  %v373_v36 = vld [vmem:[%s1821_s11 + $0x20] sm:$0xff]  ;;  %v374_v37 = vld [vmem:[%s1821_s11 + $0x28] sm:$0xff] }
  0x42   : > { %445 = vmatpush.msra.mxu0 %v419_v12  ;;  %558 = vmatpush.msra.mxu1 %v420_v13  ;;  %v375_v38 = vld [vmem:[%s1821_s11 + $0x30] sm:$0xff]  ;;  %v376_v39 = vld [vmem:[%s1821_s11 + $0x38] sm:$0xff]  ;;  %v377_v40 = vld [vmem:[%s1821_s11 + $0x40] sm:$0xff] }
  0x43   : > { %v776_v41 = vld [vmem:[#allocation9 + $0x78] sm:$0xff]  ;;  %v775_v43 = vld [vmem:[#allocation9 + $0x70] sm:$0xff]  ;;  %v774_v45 = vld [vmem:[#allocation9 + $0x68] sm:$0xff] }
  0x44   : > { %446 = vmatpush.msra.mxu0 %v417_v14  ;;  %559 = vmatpush.msra.mxu1 %v418_v15  ;;  %v792_v42 = vld [vmem:[#allocation9 + $0xf8] sm:$0xff]  ;;  %v791_v44 = vld [vmem:[#allocation9 + $0xf0] sm:$0xff]  ;;  %v790_v46 = vld [vmem:[#allocation9 + $0xe8] sm:$0xff] }
  0x45   : > { %793 = vmatpush.msra.mxu2 %v776_v41  ;;  %906 = vmatpush.msra.mxu3 %v792_v42  ;;  %v378_v47 = vld [vmem:[%s1821_s11 + $0x48] sm:$0xff]  ;;  %v772_v50 = vld [vmem:[#allocation9 + $0x58] sm:$0xff]  ;;  %v771_v52 = vld [vmem:[#allocation9 + $0x50] sm:$0xff] }
  0x46   : > { %447 = vmatpush.msra.mxu0 %v415_v16  ;;  %560 = vmatpush.msra.mxu1 %v416_v17  ;;  %v773_v48 = vld [vmem:[#allocation9 + $0x60] sm:$0xff]  ;;  %v788_v51 = vld [vmem:[#allocation9 + $0xd8] sm:$0xff]  ;;  %v787_v53 = vld [vmem:[#allocation9 + $0xd0] sm:$0xff] }
  0x47   : > { %794 = vmatpush.msra.mxu2 %v775_v43  ;;  %907 = vmatpush.msra.mxu3 %v791_v44  ;;  %v789_v49 = vld [vmem:[#allocation9 + $0xe0] sm:$0xff]  ;;  %v770_v54 = vld [vmem:[#allocation9 + $0x48] sm:$0xff]  ;;  %v768_v59 = vld [vmem:[#allocation9 + $0x38] sm:$0xff] }
  0x48   : > { %448 = vmatpush.msra.mxu0 %v413_v18  ;;  %561 = vmatpush.msra.mxu1 %v414_v19  ;;  %v786_v55 = vld [vmem:[#allocation9 + $0xc8] sm:$0xff]  ;;  %v769_v57 = vld [vmem:[#allocation9 + $0x40] sm:$0xff]  ;;  %v784_v60 = vld [vmem:[#allocation9 + $0xb8] sm:$0xff] }
  0x49   : > { %795 = vmatpush.msra.mxu2 %v774_v45  ;;  %908 = vmatpush.msra.mxu3 %v790_v46  ;;  %v379_v56 = vld [vmem:[%s1821_s11 + $0x50] sm:$0xff]  ;;  %v785_v58 = vld [vmem:[#allocation9 + $0xc0] sm:$0xff]  ;;  %v380_v1 = vld [vmem:[%s1821_s11 + $0x58] sm:$0xff] }
  0x4a   : > { %449 = vmatpush.msra.mxu0 %v411_v20  ;;  %562 = vmatpush.msra.mxu1 %v412_v21  ;;  %v767_v61 = vld [vmem:[#allocation9 + $0x30] sm:$0xff]  ;;  %v766_v63 = vld [vmem:[#allocation9 + $0x28] sm:$0xff]  ;;  %v765_v2 = vld [vmem:[#allocation9 + $0x20] sm:$0xff] }
  0x4b   : > { %796 = vmatpush.msra.mxu2 %v773_v48  ;;  %909 = vmatpush.msra.mxu3 %v789_v49  ;;  %v783_v62 = vld [vmem:[#allocation9 + $0xb0] sm:$0xff]  ;;  %v782_v0 = vld [vmem:[#allocation9 + $0xa8] sm:$0xff]  ;;  %v781_v3 = vld [vmem:[#allocation9 + $0xa0] sm:$0xff] }
  0x4c   : > { %450 = vmatpush.msra.mxu0 %v409_v22  ;;  %563 = vmatpush.msra.mxu1 %v410_v23  ;;  %v764_v4 = vld [vmem:[#allocation9 + $0x18] sm:$0xff]  ;;  %v763_v6 = vld [vmem:[#allocation9 + $0x10] sm:$0xff]  ;;  %v762_v9 = vld [vmem:[#allocation9 + $0x8] sm:$0xff] }
  0x4d   : > { %797 = vmatpush.msra.mxu2 %v772_v50  ;;  %910 = vmatpush.msra.mxu3 %v788_v51  ;;  %v780_v5 = vld [vmem:[#allocation9 + $0x98] sm:$0xff]  ;;  %v779_v7 = vld [vmem:[#allocation9 + $0x90] sm:$0xff]  ;;  %v778_v10 = vld [vmem:[#allocation9 + $0x88] sm:$0xff] }
  0x4e   : > { %451 = vmatpush.msra.mxu0 %v407_v24  ;;  %564 = vmatpush.msra.mxu1 %v408_v25  ;;  %v381_v8 = vld [vmem:[%s1821_s11 + $0x60] sm:$0xff]  ;;  %v382_v13 = vld [vmem:[%s1821_s11 + $0x68] sm:$0xff]  ;;  %v383_v14 = vld [vmem:[%s1821_s11 + $0x70] sm:$0xff] }
  0x4f   : > { %798 = vmatpush.msra.mxu2 %v771_v52  ;;  %911 = vmatpush.msra.mxu3 %v787_v53  ;;  %v761_v11 = vld [vmem:[#allocation9] sm:$0xff]  ;;  %v384_v15 = vld [vmem:[%s1821_s11 + $0x78] sm:$0xff]  ;;  %v433_v16 = vld [vmem:[#allocation8] sm:$0x3] }
  0x50   : > { %452 = vmatpush.msra.mxu0 %v405_v26  ;;  %565 = vmatpush.msra.mxu1 %v406_v27  ;;  %v777_v12 = vld [vmem:[#allocation9 + $0x80] sm:$0xff]  ;;  %v1851_v17 = vperm.slane %v433_v16, 0  ;;  %v1853_v18 = vperm.slane %v433_v16, 1  ;;  %v388_v42 = vld [vmem:[%s1821_s11 + $0x98] sm:$0xff] }
  0x51   : > { %799 = vmatpush.msra.mxu2 %v770_v54  ;;  %912 = vmatpush.msra.mxu3 %v786_v55  ;;  %v385_v21 = vld [vmem:[%s1821_s11 + $0x80] sm:$0xff] }
  0x52   : > { %453 = vmatpush.msra.mxu0 %v403_v28  ;;  %566 = vmatpush.msra.mxu1 %v404_v29  ;;  %v386_v28 = vld [vmem:[%s1821_s11 + $0x88] sm:$0xff]  ;;  %v389_v49 = vld [vmem:[%s1821_s11 + $0xa0] sm:$0xff] }
  0x53   : > { %800 = vmatpush.msra.mxu2 %v769_v57  ;;  %913 = vmatpush.msra.mxu3 %v785_v58 }
  0x54   : > { %454 = vmatpush.msra.mxu0 %v401_v30  ;;  %567 = vmatpush.msra.mxu1 %v402_v31 }
  0x55   : > { %455 = vmatmul.f32.vlgmr.msra.gmra.mxu0 %v369_v32  ;;  %568 = vmatmul.f32.vlgmr.msra.gmra.mxu1 %v369_v32 }
  0x56   : > { %801 = vmatpush.msra.mxu2 %v768_v59  ;;  %914 = vmatpush.msra.mxu3 %v784_v60 }
  0x58   : > { %802 = vmatpush.msra.mxu2 %v767_v61  ;;  %915 = vmatpush.msra.mxu3 %v783_v62 }
  0x5a   : > { %803 = vmatpush.msra.mxu2 %v766_v63  ;;  %916 = vmatpush.msra.mxu3 %v782_v0  ;;  %v391_v63 = vld [vmem:[%s1821_s11 + $0xb0] sm:$0xff] }
  0x5c   : > { %804 = vmatpush.msra.mxu2 %v765_v2  ;;  %917 = vmatpush.msra.mxu3 %v781_v3 }
  0x5d   : > { %458 = vmatmul.f32.gmra.mxu0 %v370_v33  ;;  %571 = vmatmul.f32.gmra.mxu1 %v370_v33 }
  0x5e   : > { %805 = vmatpush.msra.mxu2 %v764_v4  ;;  %918 = vmatpush.msra.mxu3 %v780_v5 }
  0x60   : > { %806 = vmatpush.msra.mxu2 %v763_v6  ;;  %919 = vmatpush.msra.mxu3 %v779_v7  ;;  %v392_v6 = vld [vmem:[%s1821_s11 + $0xb8] sm:$0xff] }
  0x62   : > { %807 = vmatpush.msra.mxu2 %v762_v9  ;;  %920 = vmatpush.msra.mxu3 %v778_v10 }
  0x64   : > { %808 = vmatpush.msra.mxu2 %v761_v11  ;;  %921 = vmatpush.msra.mxu3 %v777_v12 }
  0x65   : > { %461 = vmatmul.f32.gmra.mxu0 %v371_v34  ;;  %574 = vmatmul.f32.gmra.mxu1 %v371_v34 }
  0x6d   : > { %464 = vmatmul.f32.gmra.mxu0 %v372_v35  ;;  %577 = vmatmul.f32.gmra.mxu1 %v372_v35  ;;  %v387_v35 = vld [vmem:[%s1821_s11 + $0x90] sm:$0xff] }
  0x75   : > { %467 = vmatmul.f32.gmra.mxu0 %v373_v36  ;;  %580 = vmatmul.f32.gmra.mxu1 %v373_v36 }
  0x7d   : > { %470 = vmatmul.f32.gmra.mxu0 %v374_v37  ;;  %583 = vmatmul.f32.gmra.mxu1 %v374_v37 }
  0x85   : > { %473 = vmatmul.f32.gmra.mxu0 %v375_v38  ;;  %586 = vmatmul.f32.gmra.mxu1 %v375_v38 }
  0x8d   : > { %476 = vmatmul.f32.gmra.mxu0 %v376_v39  ;;  %589 = vmatmul.f32.gmra.mxu1 %v376_v39 }
  0x95   : > { %479 = vmatmul.f32.gmra.mxu0 %v377_v40  ;;  %592 = vmatmul.f32.gmra.mxu1 %v377_v40 }
  0x9d   : > { %482 = vmatmul.f32.gmra.mxu0 %v378_v47  ;;  %595 = vmatmul.f32.gmra.mxu1 %v378_v47 }
  0xa5   : > { %485 = vmatmul.f32.gmra.mxu0 %v379_v56  ;;  %598 = vmatmul.f32.gmra.mxu1 %v379_v56  ;;  %v390_v56 = vld [vmem:[%s1821_s11 + $0xa8] sm:$0xff] }
  0xad   : > { %488 = vmatmul.f32.gmra.mxu0 %v380_v1  ;;  %601 = vmatmul.f32.gmra.mxu1 %v380_v1 }
  0xb5   : > { %491 = vmatmul.f32.gmra.mxu0 %v381_v8  ;;  %604 = vmatmul.f32.gmra.mxu1 %v381_v8 }
  0xbd   : > { %494 = vmatmul.f32.gmra.mxu0 %v382_v13  ;;  %607 = vmatmul.f32.gmra.mxu1 %v382_v13  ;;  %v393_v13 = vld [vmem:[%s1821_s11 + $0xc0] sm:$0xff] }
  0xc5   : > { %497 = vmatmul.f32.gmra.mxu0 %v383_v14  ;;  %610 = vmatmul.f32.gmra.mxu1 %v383_v14 }
  0xcd   : > { %500 = vmatmul.f32.gmra.mxu0 %v384_v15  ;;  %613 = vmatmul.f32.gmra.mxu1 %v384_v15 }
  0xd2   : > { %v456_v19 = vpop.f32.mrf.mxu0  ;;  %v569_v20 = vpop.f32.mrf.mxu1 }
  0xd3   : > { %v457_v22 = vadd.f32 %v456_v19, %v1851_v17  ;;  %v570_v23 = vadd.f32 %v569_v20, %v1853_v18 }
  0xd5   : > { %503 = vmatmul.f32.gmra.mxu0 %v385_v21  ;;  %616 = vmatmul.f32.gmra.mxu1 %v385_v21  ;;  %v665_v24 = vmax.f32 %v457_v22, 0.0  ;;  %v666_v25 = vmax.f32 %v570_v23, 0.0  ;;  %v394_v22 = vld [vmem:[%s1821_s11 + $0xc8] sm:$0xff] }
  0xd7   : > { %809 = vmatmul.f32.vlgmr.msra.gmra.mxu2 %v665_v24  ;;  %922 = vmatmul.f32.vlgmr.msra.gmra.mxu3 %v666_v25 }
  0xda   : > { %v459_v26 = vpop.f32.mrf.mxu0  ;;  %v572_v27 = vpop.f32.mrf.mxu1 }
  0xdb   : > { %v460_v29 = vadd.f32 %v459_v26, %v1851_v17  ;;  %v573_v30 = vadd.f32 %v572_v27, %v1853_v18 }
  0xdd   : > { %506 = vmatmul.f32.gmra.mxu0 %v386_v28  ;;  %619 = vmatmul.f32.gmra.mxu1 %v386_v28  ;;  %v667_v31 = vmax.f32 %v460_v29, 0.0  ;;  %v668_v32 = vmax.f32 %v573_v30, 0.0  ;;  %v395_v29 = vld [vmem:[%s1821_s11 + $0xd0] sm:$0xff] }
  0xdf   : > { %812 = vmatmul.f32.gmra.mxu2 %v667_v31  ;;  %925 = vmatmul.f32.gmra.mxu3 %v668_v32 }
  0xe2   : > { %v462_v33 = vpop.f32.mrf.mxu0  ;;  %v575_v34 = vpop.f32.mrf.mxu1 }
  0xe3   : > { %v463_v36 = vadd.f32 %v462_v33, %v1851_v17  ;;  %v576_v37 = vadd.f32 %v575_v34, %v1853_v18 }
  0xe5   : > { %509 = vmatmul.f32.gmra.mxu0 %v387_v35  ;;  %622 = vmatmul.f32.gmra.mxu1 %v387_v35  ;;  %v669_v38 = vmax.f32 %v463_v36, 0.0  ;;  %v670_v39 = vmax.f32 %v576_v37, 0.0  ;;  %v396_v36 = vld [vmem:[%s1821_s11 + $0xd8] sm:$0xff] }
  0xe7   : > { %815 = vmatmul.f32.gmra.mxu2 %v669_v38  ;;  %928 = vmatmul.f32.gmra.mxu3 %v670_v39 }
  0xea   : > { %v465_v40 = vpop.f32.mrf.mxu0  ;;  %v578_v41 = vpop.f32.mrf.mxu1 }
  0xeb   : > { %v466_v43 = vadd.f32 %v465_v40, %v1851_v17  ;;  %v579_v44 = vadd.f32 %v578_v41, %v1853_v18 }
  0xed   : > { %512 = vmatmul.f32.gmra.mxu0 %v388_v42  ;;  %625 = vmatmul.f32.gmra.mxu1 %v388_v42  ;;  %v671_v45 = vmax.f32 %v466_v43, 0.0  ;;  %v672_v46 = vmax.f32 %v579_v44, 0.0  ;;  %v397_v43 = vld [vmem:[%s1821_s11 + $0xe0] sm:$0xff] }
  0xef   : > { %818 = vmatmul.f32.gmra.mxu2 %v671_v45  ;;  %931 = vmatmul.f32.gmra.mxu3 %v672_v46 }
  0xf2   : > { %v468_v47 = vpop.f32.mrf.mxu0  ;;  %v581_v48 = vpop.f32.mrf.mxu1 }
  0xf3   : > { %v469_v50 = vadd.f32 %v468_v47, %v1851_v17  ;;  %v582_v51 = vadd.f32 %v581_v48, %v1853_v18 }
  0xf5   : > { %515 = vmatmul.f32.gmra.mxu0 %v389_v49  ;;  %628 = vmatmul.f32.gmra.mxu1 %v389_v49  ;;  %v673_v52 = vmax.f32 %v469_v50, 0.0  ;;  %v674_v53 = vmax.f32 %v582_v51, 0.0  ;;  %v398_v50 = vld [vmem:[%s1821_s11 + $0xe8] sm:$0xff] }
  0xf7   : > { %821 = vmatmul.f32.gmra.mxu2 %v673_v52  ;;  %934 = vmatmul.f32.gmra.mxu3 %v674_v53 }
  0xfa   : > { %v471_v54 = vpop.f32.mrf.mxu0  ;;  %v584_v55 = vpop.f32.mrf.mxu1 }
  0xfb   : > { %v472_v57 = vadd.f32 %v471_v54, %v1851_v17  ;;  %v585_v58 = vadd.f32 %v584_v55, %v1853_v18 }
  0xfd   : > { %518 = vmatmul.f32.gmra.mxu0 %v390_v56  ;;  %631 = vmatmul.f32.gmra.mxu1 %v390_v56  ;;  %v675_v59 = vmax.f32 %v472_v57, 0.0  ;;  %v676_v60 = vmax.f32 %v585_v58, 0.0  ;;  %v399_v57 = vld [vmem:[%s1821_s11 + $0xf0] sm:$0xff] }
  0xff   : > { %824 = vmatmul.f32.gmra.mxu2 %v675_v59  ;;  %937 = vmatmul.f32.gmra.mxu3 %v676_v60 }
 0x102   : > { %v474_v61 = vpop.f32.mrf.mxu0  ;;  %v587_v62 = vpop.f32.mrf.mxu1 }
 0x103   : > { %v475_v0 = vadd.f32 %v474_v61, %v1851_v17  ;;  %v588_v1 = vadd.f32 %v587_v62, %v1853_v18 }
 0x105   : > { %521 = vmatmul.f32.gmra.mxu0 %v391_v63  ;;  %634 = vmatmul.f32.gmra.mxu1 %v391_v63  ;;  %v677_v2 = vmax.f32 %v475_v0, 0.0  ;;  %v678_v3 = vmax.f32 %v588_v1, 0.0  ;;  %v400_v0 = vld [vmem:[%s1821_s11 + $0xf8] sm:$0xff] }
 0x107   : > { %827 = vmatmul.f32.gmra.mxu2 %v677_v2  ;;  %940 = vmatmul.f32.gmra.mxu3 %v678_v3 }
 0x10a   : > { %v477_v4 = vpop.f32.mrf.mxu0  ;;  %v590_v5 = vpop.f32.mrf.mxu1 }
 0x10b   : > { %v478_v7 = vadd.f32 %v477_v4, %v1851_v17  ;;  %v591_v8 = vadd.f32 %v590_v5, %v1853_v18 }
 0x10d   : > { %524 = vmatmul.f32.gmra.mxu0 %v392_v6  ;;  %637 = vmatmul.f32.gmra.mxu1 %v392_v6  ;;  %v679_v9 = vmax.f32 %v478_v7, 0.0  ;;  %v680_v10 = vmax.f32 %v591_v8, 0.0 }
 0x10f   : > { %830 = vmatmul.f32.gmra.mxu2 %v679_v9  ;;  %943 = vmatmul.f32.gmra.mxu3 %v680_v10 }
 0x112   : > { %v480_v11 = vpop.f32.mrf.mxu0  ;;  %v593_v12 = vpop.f32.mrf.mxu1 }
 0x113   : > { %v481_v14 = vadd.f32 %v480_v11, %v1851_v17  ;;  %v594_v15 = vadd.f32 %v593_v12, %v1853_v18 }
 0x115   : > { %v681_v16 = vmax.f32 %v481_v14, 0.0  ;;  %v682_v19 = vmax.f32 %v594_v15, 0.0  ;;  %527 = vmatmul.f32.gmra.mxu0 %v393_v13  ;;  %640 = vmatmul.f32.gmra.mxu1 %v393_v13  ;;  %v1908_v13 = vld [vmem:[%s2051_s4] ss:$0 sm:$0xff] }
 0x117   : > { %833 = vmatmul.f32.gmra.mxu2 %v681_v16  ;;  %946 = vmatmul.f32.gmra.mxu3 %v682_v19 }
 0x11a   : > { %v483_v20 = vpop.f32.mrf.mxu0  ;;  %v596_v21 = vpop.f32.mrf.mxu1 }
 0x11b   : > { %v484_v23 = vadd.f32 %v483_v20, %v1851_v17  ;;  %v597_v24 = vadd.f32 %v596_v21, %v1853_v18 }
 0x11d   : > { %v683_v25 = vmax.f32 %v484_v23, 0.0  ;;  %v684_v26 = vmax.f32 %v597_v24, 0.0  ;;  %530 = vmatmul.f32.gmra.mxu0 %v394_v22  ;;  %643 = vmatmul.f32.gmra.mxu1 %v394_v22 }
 0x11f   : > { %836 = vmatmul.f32.gmra.mxu2 %v683_v25  ;;  %949 = vmatmul.f32.gmra.mxu3 %v684_v26 }
 0x122   : > { %v486_v27 = vpop.f32.mrf.mxu0  ;;  %v599_v28 = vpop.f32.mrf.mxu1 }
 0x123   : > { %v487_v30 = vadd.f32 %v486_v27, %v1851_v17  ;;  %v600_v31 = vadd.f32 %v599_v28, %v1853_v18 }
 0x125   : > { %v685_v32 = vmax.f32 %v487_v30, 0.0  ;;  %v686_v33 = vmax.f32 %v600_v31, 0.0  ;;  %533 = vmatmul.f32.gmra.mxu0 %v395_v29  ;;  %646 = vmatmul.f32.gmra.mxu1 %v395_v29 }
 0x127   : > { %839 = vmatmul.f32.gmra.mxu2 %v685_v32  ;;  %952 = vmatmul.f32.gmra.mxu3 %v686_v33 }
 0x12a   : > { %v489_v34 = vpop.f32.mrf.mxu0  ;;  %v602_v35 = vpop.f32.mrf.mxu1 }
 0x12b   : > { %v490_v37 = vadd.f32 %v489_v34, %v1851_v17  ;;  %v603_v38 = vadd.f32 %v602_v35, %v1853_v18 }
 0x12d   : > { %v687_v39 = vmax.f32 %v490_v37, 0.0  ;;  %v688_v40 = vmax.f32 %v603_v38, 0.0  ;;  %536 = vmatmul.f32.gmra.mxu0 %v396_v36  ;;  %649 = vmatmul.f32.gmra.mxu1 %v396_v36 }
 0x12f   : > { %842 = vmatmul.f32.gmra.mxu2 %v687_v39  ;;  %955 = vmatmul.f32.gmra.mxu3 %v688_v40 }
 0x132   : > { %v492_v41 = vpop.f32.mrf.mxu0  ;;  %v605_v42 = vpop.f32.mrf.mxu1 }
 0x133   : > { %v493_v44 = vadd.f32 %v492_v41, %v1851_v17  ;;  %v606_v45 = vadd.f32 %v605_v42, %v1853_v18 }
 0x135   : > { %v689_v46 = vmax.f32 %v493_v44, 0.0  ;;  %v690_v47 = vmax.f32 %v606_v45, 0.0  ;;  %539 = vmatmul.f32.gmra.mxu0 %v397_v43  ;;  %652 = vmatmul.f32.gmra.mxu1 %v397_v43 }
 0x137   : > { %845 = vmatmul.f32.gmra.mxu2 %v689_v46  ;;  %958 = vmatmul.f32.gmra.mxu3 %v690_v47 }
 0x13a   : > { %v495_v48 = vpop.f32.mrf.mxu0  ;;  %v608_v49 = vpop.f32.mrf.mxu1 }
 0x13b   : > { %v496_v51 = vadd.f32 %v495_v48, %v1851_v17  ;;  %v609_v52 = vadd.f32 %v608_v49, %v1853_v18 }
 0x13d   : > { %v691_v53 = vmax.f32 %v496_v51, 0.0  ;;  %v692_v54 = vmax.f32 %v609_v52, 0.0  ;;  %542 = vmatmul.f32.gmra.mxu0 %v398_v50  ;;  %655 = vmatmul.f32.gmra.mxu1 %v398_v50 }
 0x13f   : > { %848 = vmatmul.f32.gmra.mxu2 %v691_v53  ;;  %961 = vmatmul.f32.gmra.mxu3 %v692_v54 }
 0x142   : > { %v498_v55 = vpop.f32.mrf.mxu0  ;;  %v611_v56 = vpop.f32.mrf.mxu1 }
 0x143   : > { %v499_v58 = vadd.f32 %v498_v55, %v1851_v17  ;;  %v612_v59 = vadd.f32 %v611_v56, %v1853_v18 }
 0x145   : > { %v693_v60 = vmax.f32 %v499_v58, 0.0  ;;  %v694_v61 = vmax.f32 %v612_v59, 0.0  ;;  %545 = vmatmul.f32.gmra.mxu0 %v399_v57  ;;  %658 = vmatmul.f32.gmra.mxu1 %v399_v57 }
 0x147   : > { %851 = vmatmul.f32.gmra.mxu2 %v693_v60  ;;  %964 = vmatmul.f32.gmra.mxu3 %v694_v61 }
 0x14a   : > { %v501_v62 = vpop.f32.mrf.mxu0  ;;  %v614_v63 = vpop.f32.mrf.mxu1 }
 0x14b   : > { %v502_v1 = vadd.f32 %v501_v62, %v1851_v17  ;;  %v615_v2 = vadd.f32 %v614_v63, %v1853_v18 }
 0x14d   : > { %v695_v3 = vmax.f32 %v502_v1, 0.0  ;;  %v696_v4 = vmax.f32 %v615_v2, 0.0  ;;  %548 = vmatmul.f32.gmra.mxu0 %v400_v0  ;;  %661 = vmatmul.f32.gmra.mxu1 %v400_v0 }
 0x14f   : > { %854 = vmatmul.f32.gmra.mxu2 %v695_v3  ;;  %967 = vmatmul.f32.gmra.mxu3 %v696_v4 }
 0x152   : > { %v504_v5 = vpop.f32.mrf.mxu0  ;;  %v617_v6 = vpop.f32.mrf.mxu1 }
 0x153   : > { %v505_v7 = vadd.f32 %v504_v5, %v1851_v17  ;;  %v618_v8 = vadd.f32 %v617_v6, %v1853_v18 }
 0x155   : > { %v697_v9 = vmax.f32 %v505_v7, 0.0  ;;  %v698_v10 = vmax.f32 %v618_v8, 0.0 }
 0x157   : > { %857 = vmatmul.f32.gmra.mxu2 %v697_v9  ;;  %970 = vmatmul.f32.gmra.mxu3 %v698_v10 }
 0x15a   : > { %v507_v11 = vpop.f32.mrf.mxu0  ;;  %v620_v12 = vpop.f32.mrf.mxu1 }
 0x15b   : > { %v508_v14 = vadd.f32 %v507_v11, %v1851_v17  ;;  %v621_v15 = vadd.f32 %v620_v12, %v1853_v18  ;;  %v810_v16 = vpop.f32.mrf.mxu2  ;;  %v923_v19 = vpop.f32.mrf.mxu3 }
 0x15c   : > { %v924_v20 = vadd.f32 %v923_v19, %v810_v16 }
 0x15d   : > { %v699_v21 = vmax.f32 %v508_v14, 0.0  ;;  %v700_v22 = vmax.f32 %v621_v15, 0.0 }
 0x15e   : > { %v1122_v23 = vadd.f32 %v1908_v13, %v924_v20 }
 0x15f   : > { %860 = vmatmul.f32.gmra.mxu2 %v699_v21  ;;  %973 = vmatmul.f32.gmra.mxu3 %v700_v22 }
 0x160   : > { %1154 = vst [vmem:[%s1915_s3] sm:$0xff] %v1122_v23 }
 0x162   : > { %v510_v24 = vpop.f32.mrf.mxu0  ;;  %v623_v25 = vpop.f32.mrf.mxu1 }
 0x163   : > { %v511_v26 = vadd.f32 %v510_v24, %v1851_v17  ;;  %v624_v27 = vadd.f32 %v623_v25, %v1853_v18  ;;  %v813_v28 = vpop.f32.mrf.mxu2  ;;  %v926_v29 = vpop.f32.mrf.mxu3 }
 0x164   : > { %v927_v30 = vadd.f32 %v926_v29, %v813_v28 }
 0x165   : > { %v701_v31 = vmax.f32 %v511_v26, 0.0  ;;  %v702_v32 = vmax.f32 %v624_v27, 0.0 }
 0x166   : > { %v1123_v33 = vadd.f32 %v1908_v13, %v927_v30 }
 0x167   : > { %863 = vmatmul.f32.gmra.mxu2 %v701_v31  ;;  %976 = vmatmul.f32.gmra.mxu3 %v702_v32 }
 0x168   : > { %1155 = vst [vmem:[%s1915_s3 + $0x8] sm:$0xff] %v1123_v33 }
 0x16a   : > { %v513_v34 = vpop.f32.mrf.mxu0  ;;  %v626_v35 = vpop.f32.mrf.mxu1 }
 0x16b   : > { %v514_v36 = vadd.f32 %v513_v34, %v1851_v17  ;;  %v627_v37 = vadd.f32 %v626_v35, %v1853_v18  ;;  %v816_v38 = vpop.f32.mrf.mxu2  ;;  %v929_v39 = vpop.f32.mrf.mxu3 }
 0x16c   : > { %v930_v40 = vadd.f32 %v929_v39, %v816_v38 }
 0x16d   : > { %v703_v41 = vmax.f32 %v514_v36, 0.0  ;;  %v704_v42 = vmax.f32 %v627_v37, 0.0 }
 0x16e   : > { %v1124_v43 = vadd.f32 %v1908_v13, %v930_v40 }
 0x16f   : > { %866 = vmatmul.f32.gmra.mxu2 %v703_v41  ;;  %979 = vmatmul.f32.gmra.mxu3 %v704_v42 }
 0x170   : > { %1156 = vst [vmem:[%s1915_s3 + $0x10] sm:$0xff] %v1124_v43 }
 0x172   : > { %v516_v44 = vpop.f32.mrf.mxu0  ;;  %v629_v45 = vpop.f32.mrf.mxu1 }
 0x173   : > { %v517_v46 = vadd.f32 %v516_v44, %v1851_v17  ;;  %v630_v47 = vadd.f32 %v629_v45, %v1853_v18  ;;  %v819_v48 = vpop.f32.mrf.mxu2  ;;  %v932_v49 = vpop.f32.mrf.mxu3 }
 0x174   : > { %v933_v50 = vadd.f32 %v932_v49, %v819_v48 }
 0x175   : > { %v705_v51 = vmax.f32 %v517_v46, 0.0  ;;  %v706_v52 = vmax.f32 %v630_v47, 0.0 }
 0x176   : > { %v1125_v53 = vadd.f32 %v1908_v13, %v933_v50 }
 0x177   : > { %869 = vmatmul.f32.gmra.mxu2 %v705_v51  ;;  %982 = vmatmul.f32.gmra.mxu3 %v706_v52 }
 0x178   : > { %1157 = vst [vmem:[%s1915_s3 + $0x18] sm:$0xff] %v1125_v53 }
 0x17a   : > { %v519_v54 = vpop.f32.mrf.mxu0  ;;  %v632_v55 = vpop.f32.mrf.mxu1 }
 0x17b   : > { %v520_v56 = vadd.f32 %v519_v54, %v1851_v17  ;;  %v633_v57 = vadd.f32 %v632_v55, %v1853_v18  ;;  %v822_v58 = vpop.f32.mrf.mxu2  ;;  %v935_v59 = vpop.f32.mrf.mxu3 }
 0x17c   : > { %v936_v60 = vadd.f32 %v935_v59, %v822_v58 }
 0x17d   : > { %v707_v61 = vmax.f32 %v520_v56, 0.0  ;;  %v708_v62 = vmax.f32 %v633_v57, 0.0 }
 0x17e   : > { %v1126_v63 = vadd.f32 %v1908_v13, %v936_v60 }
 0x17f   : > { %872 = vmatmul.f32.gmra.mxu2 %v707_v61  ;;  %985 = vmatmul.f32.gmra.mxu3 %v708_v62 }
 0x180   : > { %1158 = vst [vmem:[%s1915_s3 + $0x20] sm:$0xff] %v1126_v63 }
 0x182   : > { %v522_v0 = vpop.f32.mrf.mxu0  ;;  %v635_v1 = vpop.f32.mrf.mxu1 }
 0x183   : > { %v523_v2 = vadd.f32 %v522_v0, %v1851_v17  ;;  %v636_v3 = vadd.f32 %v635_v1, %v1853_v18  ;;  %v825_v4 = vpop.f32.mrf.mxu2  ;;  %v938_v5 = vpop.f32.mrf.mxu3 }
 0x184   : > { %v939_v6 = vadd.f32 %v938_v5, %v825_v4 }
 0x185   : > { %v709_v7 = vmax.f32 %v523_v2, 0.0  ;;  %v710_v8 = vmax.f32 %v636_v3, 0.0 }
 0x186   : > { %v1127_v9 = vadd.f32 %v1908_v13, %v939_v6 }
 0x187   : > { %875 = vmatmul.f32.gmra.mxu2 %v709_v7  ;;  %988 = vmatmul.f32.gmra.mxu3 %v710_v8 }
 0x188   : > { %1159 = vst [vmem:[%s1915_s3 + $0x28] sm:$0xff] %v1127_v9 }
 0x18a   : > { %v525_v10 = vpop.f32.mrf.mxu0  ;;  %v638_v11 = vpop.f32.mrf.mxu1 }
 0x18b   : > { %v526_v12 = vadd.f32 %v525_v10, %v1851_v17  ;;  %v639_v14 = vadd.f32 %v638_v11, %v1853_v18  ;;  %v828_v15 = vpop.f32.mrf.mxu2  ;;  %v941_v16 = vpop.f32.mrf.mxu3 }
 0x18c   : > { %v942_v19 = vadd.f32 %v941_v16, %v828_v15 }
 0x18d   : > { %v711_v20 = vmax.f32 %v526_v12, 0.0  ;;  %v712_v21 = vmax.f32 %v639_v14, 0.0 }
 0x18e   : > { %v1128_v22 = vadd.f32 %v1908_v13, %v942_v19 }
 0x18f   : > { %878 = vmatmul.f32.gmra.mxu2 %v711_v20  ;;  %991 = vmatmul.f32.gmra.mxu3 %v712_v21 }
 0x190   : > { %1160 = vst [vmem:[%s1915_s3 + $0x30] sm:$0xff] %v1128_v22 }
 0x192   : > { %v528_v23 = vpop.f32.mrf.mxu0  ;;  %v641_v24 = vpop.f32.mrf.mxu1 }
 0x193   : > { %v529_v25 = vadd.f32 %v528_v23, %v1851_v17  ;;  %v642_v26 = vadd.f32 %v641_v24, %v1853_v18  ;;  %v831_v27 = vpop.f32.mrf.mxu2  ;;  %v944_v28 = vpop.f32.mrf.mxu3 }
 0x194   : > { %v945_v29 = vadd.f32 %v944_v28, %v831_v27 }
 0x195   : > { %v713_v30 = vmax.f32 %v529_v25, 0.0  ;;  %v714_v31 = vmax.f32 %v642_v26, 0.0 }
 0x196   : > { %v1129_v32 = vadd.f32 %v1908_v13, %v945_v29 }
 0x197   : > { %881 = vmatmul.f32.gmra.mxu2 %v713_v30  ;;  %994 = vmatmul.f32.gmra.mxu3 %v714_v31 }
 0x198   : > { %1161 = vst [vmem:[%s1915_s3 + $0x38] sm:$0xff] %v1129_v32 }
 0x19a   : > { %v531_v33 = vpop.f32.mrf.mxu0  ;;  %v644_v34 = vpop.f32.mrf.mxu1 }
 0x19b   : > { %v532_v35 = vadd.f32 %v531_v33, %v1851_v17  ;;  %v645_v36 = vadd.f32 %v644_v34, %v1853_v18  ;;  %v834_v37 = vpop.f32.mrf.mxu2  ;;  %v947_v38 = vpop.f32.mrf.mxu3 }
 0x19c   : > { %v948_v39 = vadd.f32 %v947_v38, %v834_v37 }
 0x19d   : > { %v715_v40 = vmax.f32 %v532_v35, 0.0  ;;  %v716_v41 = vmax.f32 %v645_v36, 0.0 }
 0x19e   : > { %v1130_v42 = vadd.f32 %v1908_v13, %v948_v39 }
 0x19f   : > { %884 = vmatmul.f32.gmra.mxu2 %v715_v40  ;;  %997 = vmatmul.f32.gmra.mxu3 %v716_v41 }
 0x1a0   : > { %1162 = vst [vmem:[%s1915_s3 + $0x40] sm:$0xff] %v1130_v42 }
 0x1a2   : > { %v534_v43 = vpop.f32.mrf.mxu0  ;;  %v647_v44 = vpop.f32.mrf.mxu1 }
 0x1a3   : > { %v535_v45 = vadd.f32 %v534_v43, %v1851_v17  ;;  %v648_v46 = vadd.f32 %v647_v44, %v1853_v18  ;;  %v837_v47 = vpop.f32.mrf.mxu2  ;;  %v950_v48 = vpop.f32.mrf.mxu3 }
 0x1a4   : > { %v951_v49 = vadd.f32 %v950_v48, %v837_v47 }
 0x1a5   : > { %v717_v50 = vmax.f32 %v535_v45, 0.0  ;;  %v718_v51 = vmax.f32 %v648_v46, 0.0 }
 0x1a6   : > { %v1131_v52 = vadd.f32 %v1908_v13, %v951_v49 }
 0x1a7   : > { %887 = vmatmul.f32.gmra.mxu2 %v717_v50  ;;  %1000 = vmatmul.f32.gmra.mxu3 %v718_v51 }
 0x1a8   : > { %1163 = vst [vmem:[%s1915_s3 + $0x48] sm:$0xff] %v1131_v52 }
 0x1aa   : > { %v537_v53 = vpop.f32.mrf.mxu0  ;;  %v650_v54 = vpop.f32.mrf.mxu1 }
 0x1ab   : > { %v538_v55 = vadd.f32 %v537_v53, %v1851_v17  ;;  %v651_v56 = vadd.f32 %v650_v54, %v1853_v18  ;;  %v840_v57 = vpop.f32.mrf.mxu2  ;;  %v953_v58 = vpop.f32.mrf.mxu3 }
 0x1ac   : > { %v954_v59 = vadd.f32 %v953_v58, %v840_v57 }
 0x1ad   : > { %v719_v60 = vmax.f32 %v538_v55, 0.0  ;;  %v720_v61 = vmax.f32 %v651_v56, 0.0 }
 0x1ae   : > { %v1132_v62 = vadd.f32 %v1908_v13, %v954_v59 }
 0x1af   : > { %890 = vmatmul.f32.gmra.mxu2 %v719_v60  ;;  %1003 = vmatmul.f32.gmra.mxu3 %v720_v61 }
 0x1b0   : > { %1164 = vst [vmem:[%s1915_s3 + $0x50] sm:$0xff] %v1132_v62 }
 0x1b2   : > { %v540_v63 = vpop.f32.mrf.mxu0  ;;  %v653_v0 = vpop.f32.mrf.mxu1 }
 0x1b3   : > { %v541_v1 = vadd.f32 %v540_v63, %v1851_v17  ;;  %v654_v2 = vadd.f32 %v653_v0, %v1853_v18  ;;  %v843_v3 = vpop.f32.mrf.mxu2  ;;  %v956_v4 = vpop.f32.mrf.mxu3 }
 0x1b4   : > { %v957_v5 = vadd.f32 %v956_v4, %v843_v3 }
 0x1b5   : > { %v721_v6 = vmax.f32 %v541_v1, 0.0  ;;  %v722_v7 = vmax.f32 %v654_v2, 0.0 }
 0x1b6   : > { %v1133_v8 = vadd.f32 %v1908_v13, %v957_v5 }
 0x1b7   : > { %893 = vmatmul.f32.gmra.mxu2 %v721_v6  ;;  %1006 = vmatmul.f32.gmra.mxu3 %v722_v7 }
 0x1b8   : > { %1165 = vst [vmem:[%s1915_s3 + $0x58] sm:$0xff] %v1133_v8 }
 0x1ba   : > { %v543_v9 = vpop.f32.mrf.mxu0  ;;  %v656_v10 = vpop.f32.mrf.mxu1 }
 0x1bb   : > { %v544_v11 = vadd.f32 %v543_v9, %v1851_v17  ;;  %v657_v12 = vadd.f32 %v656_v10, %v1853_v18  ;;  %v846_v14 = vpop.f32.mrf.mxu2  ;;  %v959_v15 = vpop.f32.mrf.mxu3 }
 0x1bc   : > { %v960_v16 = vadd.f32 %v959_v15, %v846_v14 }
 0x1bd   : > { %v723_v19 = vmax.f32 %v544_v11, 0.0  ;;  %v724_v20 = vmax.f32 %v657_v12, 0.0 }
 0x1be   : > { %v1134_v21 = vadd.f32 %v1908_v13, %v960_v16 }
 0x1bf   : > { %896 = vmatmul.f32.gmra.mxu2 %v723_v19  ;;  %1009 = vmatmul.f32.gmra.mxu3 %v724_v20 }
 0x1c0   : > { %1166 = vst [vmem:[%s1915_s3 + $0x60] sm:$0xff] %v1134_v21 }
 0x1c2   : > { %v546_v22 = vpop.f32.mrf.mxu0  ;;  %v659_v23 = vpop.f32.mrf.mxu1 }
 0x1c3   : > { %v547_v24 = vadd.f32 %v546_v22, %v1851_v17  ;;  %v660_v25 = vadd.f32 %v659_v23, %v1853_v18  ;;  %v849_v26 = vpop.f32.mrf.mxu2  ;;  %v962_v27 = vpop.f32.mrf.mxu3 }
 0x1c4   : > { %v963_v28 = vadd.f32 %v962_v27, %v849_v26 }
 0x1c5   : > { %v725_v29 = vmax.f32 %v547_v24, 0.0  ;;  %v726_v30 = vmax.f32 %v660_v25, 0.0 }
 0x1c6   : > { %v1135_v31 = vadd.f32 %v1908_v13, %v963_v28 }
 0x1c7   : > { %899 = vmatmul.f32.gmra.mxu2 %v725_v29  ;;  %1012 = vmatmul.f32.gmra.mxu3 %v726_v30 }
 0x1c8   : > { %1167 = vst [vmem:[%s1915_s3 + $0x68] sm:$0xff] %v1135_v31 }
 0x1ca   : > { %v549_v32 = vpop.f32.mrf.mxu0  ;;  %v662_v33 = vpop.f32.mrf.mxu1 }
 0x1cb   : > { %v550_v34 = vadd.f32 %v549_v32, %v1851_v17  ;;  %v663_v35 = vadd.f32 %v662_v33, %v1853_v18  ;;  %v852_v36 = vpop.f32.mrf.mxu2  ;;  %v965_v37 = vpop.f32.mrf.mxu3 }
 0x1cc   : > { %v966_v38 = vadd.f32 %v965_v37, %v852_v36 }
 0x1cd   : > { %v727_v39 = vmax.f32 %v550_v34, 0.0  ;;  %v728_v40 = vmax.f32 %v663_v35, 0.0 }
 0x1ce   : > { %v1136_v41 = vadd.f32 %v1908_v13, %v966_v38 }
 0x1cf   : > { %902 = vmatmul.f32.gmra.mxu2 %v727_v39  ;;  %1015 = vmatmul.f32.gmra.mxu3 %v728_v40 }
 0x1d0   : > { %1168 = vst [vmem:[%s1915_s3 + $0x70] sm:$0xff] %v1136_v41 }
 0x1d3   : > { %v855_v42 = vpop.f32.mrf.mxu2  ;;  %v968_v43 = vpop.f32.mrf.mxu3 }
 0x1d4   : > { %v969_v44 = vadd.f32 %v968_v43, %v855_v42 }
 0x1d6   : > { %v1137_v45 = vadd.f32 %v1908_v13, %v969_v44 }
 0x1d8   : > { %1169 = vst [vmem:[%s1915_s3 + $0x78] sm:$0xff] %v1137_v45 }
 0x1db   : > { %v858_v17 = vpop.f32.mrf.mxu2  ;;  %v971_v18 = vpop.f32.mrf.mxu3 }
 0x1dc   : > { %v972_v46 = vadd.f32 %v971_v18, %v858_v17 }
 0x1de   : > { %v1138_v47 = vadd.f32 %v1908_v13, %v972_v46 }
 0x1e0   : > { %1170 = vst [vmem:[%s1915_s3 + $0x80] sm:$0xff] %v1138_v47 }
 0x1e3   : > { %v861_v48 = vpop.f32.mrf.mxu2  ;;  %v974_v49 = vpop.f32.mrf.mxu3 }
 0x1e4   : > { %v975_v50 = vadd.f32 %v974_v49, %v861_v48 }
 0x1e6   : > { %v1139_v51 = vadd.f32 %v1908_v13, %v975_v50 }
 0x1e8   : > { %1171 = vst [vmem:[%s1915_s3 + $0x88] sm:$0xff] %v1139_v51 }
 0x1eb   : > { %v864_v52 = vpop.f32.mrf.mxu2  ;;  %v977_v53 = vpop.f32.mrf.mxu3 }
 0x1ec   : > { %v978_v54 = vadd.f32 %v977_v53, %v864_v52 }
 0x1ee   : > { %v1140_v55 = vadd.f32 %v1908_v13, %v978_v54 }
 0x1f0   : > { %1172 = vst [vmem:[%s1915_s3 + $0x90] sm:$0xff] %v1140_v55 }
 0x1f3   : > { %v867_v56 = vpop.f32.mrf.mxu2  ;;  %v980_v57 = vpop.f32.mrf.mxu3 }
 0x1f4   : > { %v981_v58 = vadd.f32 %v980_v57, %v867_v56 }
 0x1f6   : > { %v1141_v59 = vadd.f32 %v1908_v13, %v981_v58 }
 0x1f8   : > { %1173 = vst [vmem:[%s1915_s3 + $0x98] sm:$0xff] %v1141_v59 }
 0x1fb   : > { %v870_v60 = vpop.f32.mrf.mxu2  ;;  %v983_v61 = vpop.f32.mrf.mxu3 }
 0x1fc   : > { %v984_v62 = vadd.f32 %v983_v61, %v870_v60 }
 0x1fe   : > { %v1142_v63 = vadd.f32 %v1908_v13, %v984_v62 }
 0x200   : > { %1174 = vst [vmem:[%s1915_s3 + $0xa0] sm:$0xff] %v1142_v63 }
 0x203   : > { %v873_v0 = vpop.f32.mrf.mxu2  ;;  %v986_v1 = vpop.f32.mrf.mxu3 }
 0x204   : > { %v987_v2 = vadd.f32 %v986_v1, %v873_v0 }
 0x206   : > { %v1143_v3 = vadd.f32 %v1908_v13, %v987_v2 }
 0x208   : > { %1175 = vst [vmem:[%s1915_s3 + $0xa8] sm:$0xff] %v1143_v3 }
 0x20b   : > { %v876_v4 = vpop.f32.mrf.mxu2  ;;  %v989_v5 = vpop.f32.mrf.mxu3 }
 0x20c   : > { %v990_v6 = vadd.f32 %v989_v5, %v876_v4 }
 0x20e   : > { %v1144_v7 = vadd.f32 %v1908_v13, %v990_v6 }
 0x210   : > { %1176 = vst [vmem:[%s1915_s3 + $0xb0] sm:$0xff] %v1144_v7 }
 0x213   : > { %v879_v8 = vpop.f32.mrf.mxu2  ;;  %v992_v9 = vpop.f32.mrf.mxu3 }
 0x214   : > { %v993_v10 = vadd.f32 %v992_v9, %v879_v8 }
 0x216   : > { %v1145_v11 = vadd.f32 %v1908_v13, %v993_v10 }
 0x218   : > { %1177 = vst [vmem:[%s1915_s3 + $0xb8] sm:$0xff] %v1145_v11 }
 0x21b   : > { %v882_v12 = vpop.f32.mrf.mxu2  ;;  %v995_v14 = vpop.f32.mrf.mxu3 }
 0x21c   : > { %v996_v15 = vadd.f32 %v995_v14, %v882_v12 }
 0x21e   : > { %v1146_v16 = vadd.f32 %v1908_v13, %v996_v15 }
 0x220   : > { %1178 = vst [vmem:[%s1915_s3 + $0xc0] sm:$0xff] %v1146_v16 }
 0x223   : > { %v885_v19 = vpop.f32.mrf.mxu2  ;;  %v998_v20 = vpop.f32.mrf.mxu3 }
 0x224   : > { %v999_v21 = vadd.f32 %v998_v20, %v885_v19 }
 0x226   : > { %v1147_v22 = vadd.f32 %v1908_v13, %v999_v21 }
 0x228   : > { %1179 = vst [vmem:[%s1915_s3 + $0xc8] sm:$0xff] %v1147_v22 }
 0x22b   : > { %v888_v23 = vpop.f32.mrf.mxu2  ;;  %v1001_v24 = vpop.f32.mrf.mxu3 }
 0x22c   : > { %v1002_v25 = vadd.f32 %v1001_v24, %v888_v23 }
 0x22e   : > { %v1148_v26 = vadd.f32 %v1908_v13, %v1002_v25 }
 0x230   : > { %1180 = vst [vmem:[%s1915_s3 + $0xd0] sm:$0xff] %v1148_v26 }
 0x233   : > { %v891_v27 = vpop.f32.mrf.mxu2  ;;  %v1004_v28 = vpop.f32.mrf.mxu3 }
 0x234   : > { %v1005_v29 = vadd.f32 %v1004_v28, %v891_v27 }
 0x236   : > { %v1149_v30 = vadd.f32 %v1908_v13, %v1005_v29 }
 0x238   : > { %1181 = vst [vmem:[%s1915_s3 + $0xd8] sm:$0xff] %v1149_v30 }
 0x23b   : > { %v894_v31 = vpop.f32.mrf.mxu2  ;;  %v1007_v32 = vpop.f32.mrf.mxu3 }
 0x23c   : > { %v1008_v33 = vadd.f32 %v1007_v32, %v894_v31 }
 0x23e   : > { %v1150_v34 = vadd.f32 %v1908_v13, %v1008_v33 }
 0x240   : > { %1182 = vst [vmem:[%s1915_s3 + $0xe0] sm:$0xff] %v1150_v34 }
 0x243   : > { %v897_v35 = vpop.f32.mrf.mxu2  ;;  %v1010_v36 = vpop.f32.mrf.mxu3 }
 0x244   : > { %v1011_v37 = vadd.f32 %v1010_v36, %v897_v35 }
 0x246   : > { %v1151_v38 = vadd.f32 %v1908_v13, %v1011_v37 }
 0x248   : > { %1183 = vst [vmem:[%s1915_s3 + $0xe8] sm:$0xff] %v1151_v38 }
 0x24b   : > { %v900_v39 = vpop.f32.mrf.mxu2  ;;  %v1013_v40 = vpop.f32.mrf.mxu3 }
 0x24c   : > { %v1014_v41 = vadd.f32 %v1013_v40, %v900_v39 }
 0x24e   : > { %v1152_v42 = vadd.f32 %v1908_v13, %v1014_v41 }
 0x250   : > { %1184 = vst [vmem:[%s1915_s3 + $0xf0] sm:$0xff] %v1152_v42 }
 0x253   : > { %v903_v43 = vpop.f32.mrf.mxu2  ;;  %v1016_v44 = vpop.f32.mrf.mxu3 }
 0x254   : > { %v1017_v45 = vadd.f32 %v1016_v44, %v903_v43 }
 0x256   : > { %v1153_v17 = vadd.f32 %v1908_v13, %v1017_v45 }
 0x258   : > { %1185 = vst [vmem:[%s1915_s3 + $0xf8] sm:$0xff] %v1153_v17 }
 0x259   : > { %1588 = shalt.err (!%p1585_p0)
}
 0x25a   : > { %s1660_s10 = smov 128   ;;  %s1661_s11 = smov 8  }
 0x25b   : > { %1355 = dma.vmem_to_hbm [thread:$0]  (%p1784_p3), %s1200_s7, 4096, %s1202_s16, %s1187_s25, %s1660_s10, %s1660_s10, %s1661_s11  }
 0x25c PF: > { %s1216_s1 = sand.u32 1, %s1631_s18   ;;  %p1372_p5 = pnand %p1324_p11, %p1741_p6 }
 0x25d   : > { %s1217_s2 = scalar_lea.sflag [#allocation5], %s1216_s1 }
 0x25e   : > { %p1373_p7 = pneg %p1372_p5 }
 0x260   : > { %1626 = dma.done.wait (%p1373_p7), %s1217_s2, 4096  }
 0x261   : > { %1628 = vsyncadd (%p1373_p7), %s1217_s2, 4294963200  ;;  %s23_s23 = sadd.s32 1, %s1651_s23   ;;  %s2071_s18 = smov %s1635_s19 }
 0x262   : > { %p20_p9 = scmp.ge.s32.totalorder %s23_s23, 4   ;;  %s2072_s19 = smov %s1639_s20 }
 0x263   : > { %s2073_s20 = smov %s1800_s27  ;;  %s2074_s21 = smov %s1647_s22 }
 0x264   : > { %s2075_s22 = smov %s2077_s15  ;;  %22 = sbr.rel (!%p20_p9) target bundleno = 12 (0xc), region = 108 }
 0x269   :  { %1223 = vsyncpa [#allocation4], 1 }
 0x26a   :  { %1225 = vsyncpa [#allocation4 + $0x1], 1 }
 0x26b   :  { %1226 = vsyncpa [#allocation7], 1 }
 0x26c   :  { %1227 = vsyncpa [#allocation10], 1 }
 0x26d   :  { %1228 = vsyncpa [#allocation5], 1 }
 0x26e   :  { %1230 = vsyncpa [#allocation5 + $0x1], 1 }

// kernel: tpu_custom_call.1
= control target key start
LH: loop header
LB: loop body
LE: loop exit
PB: predicated region body
PF: predicated region fallthrough
CT: control target
= control target key end

     0   :  { %s2047_s0 = inlined_call_operand.hbm [shape: f32[512,128], index: 0, kind: input, shape index: {}]   ;;  %s2048_s1 = inlined_call_operand.hbm [shape: f32[128,256], index: 1, kind: input, shape index: {}]   ;;  %s2049_s2 = inlined_call_operand.hbm [shape: f32[1,256], index: 2, kind: input, shape index: {}]   ;;  %s2050_s3 = inlined_call_operand.hbm [shape: f32[256,128], index: 3, kind: input, shape index: {}]   ;;  %s2051_s4 = inlined_call_operand.vmem [shape: f32[1,128], index: 4, kind: input, shape index: {}]   ;;  %s2052_s5 = inlined_call_operand.hbm [shape: f32[512,128], index: 5, kind: output, shape index: {}]  }
   0x1   :  { %2055 = sst [smem:[#allocation16_spill]] %s2048_s1 }
   0x2   :  { %2056 = sst [smem:[#allocation17_spill]] %s2049_s2 }
   0x3   :  { %2057 = sst [smem:[#allocation18_spill]] %s2050_s3 }
   0x4   :  { %10 = vsyncpa [#allocation4], 0 }
   0x5   :  { %12 = vsyncpa [#allocation4 + $0x1], 0 }
   0x6   :  { %13 = vsyncpa [#allocation7], 0 }
   0x7   :  { %14 = vsyncpa [#allocation10], 0 }
   0x8   :  { %15 = vsyncpa [#allocation5], 0 }
   0x9   :  { %17 = vsyncpa [#allocation5 + $0x1], 0  ;;  %s1692_s18 = smov 0   ;;  %s1694_s19 = smov 0  }
   0xa   :  { %s1696_s20 = smov 0   ;;  %s1698_s21 = smov 0  }
   0xb   :  { %s1700_s22 = smov 0   ;;  %s1702_s23 = smov 0  }
   0xc LB: > { %s1318_s24 = sadd.s32 4294967295, %s1651_s23   ;;  %s1319_s25 = sadd.s32 4294967294, %s1651_s23   ;;  %s1651_s23 = sphi %s1702_s23, %s23_s23   ;;  %s1647_s22 = sphi %s1700_s22, %s2075_s22   ;;  %s1643_s21 = sphi %s1698_s21, %s2074_s21   ;;  %s1639_s20 = sphi %s1696_s20, %s2073_s20   ;;  %s1635_s19 = sphi %s1694_s19, %s2072_s19   ;;  %s1631_s18 = sphi %s1692_s18, %s2071_s18  }
   0xd   : > { %p55_p0 = scmp.ne.s32.totalorder %s1635_s19, %s1631_s18  ;;  %p1726_p1 = scmp.eq.s32.totalorder %s1318_s24, 0 }
   0xe   : > { %p1730_p2 = scmp.eq.s32.totalorder %s1318_s24, 1  ;;  %p184_p3 = scmp.eq.s32.totalorder %s1319_s25, 1 }
   0xf   : > { %p1736_p4 = por %p1726_p1, %p55_p0  ;;  %p1320_p5 = scmp.ge.s32.totalorder %s1651_s23, 1 }
  0x10   : > { %p1741_p6 = por %p184_p3, %p55_p0  ;;  %p191_p7 = scmp.lt.s32.totalorder %s1651_s23, 3 }
  0x11   : > { %s2062_s1 = sld [smem:[#allocation16_spill]]  ;;  %s1653_s9 = smov [#allocation6]  }
  0x12   : > { %p1749_p8 = pnand %p1320_p5, %p191_p7  ;;  %s207_s10 = sshll.u32 %s1653_s9, 4  ;;  %s208_s10 = int_to_ptr.vmem [resolvable:$true] %s207_s10 }
  0x13   : > { %p1324_p11 = scmp.ge.s32.totalorder %s1651_s23, 2  ;;  %s2065_s2 = sld [smem:[#allocation17_spill]] }
  0x14   : > { %p1357_p9 = pneg %p1749_p8  ;;  %s1654_s15 = smov 256  }
  0x15   : > { %s1655_s16 = smov 16   ;;  %s1656_s17 = smov [#allocation8]  }
  0x16   : > { %p1757_p10 = pnand %p1357_p9, %p1726_p1  ;;  %s224_s24 = sshll.u32 %s1656_s17, 4  ;;  %s225_s24 = int_to_ptr.vmem [resolvable:$true] %s224_s24 }
  0x17   : > { %s205_s7 = sshll.u32 %s2062_s1, 4  ;;  %s2066_s3 = sld [smem:[#allocation18_spill]]  ;;  %s206_s7 = int_to_ptr.hbm [resolvable:$true] %s205_s7 }
  0x18   : > { %1360 = dma.hbm_to_vmem [thread:$0]  (!%p1757_p10), %s206_s7, 4096, %s208_s10, [#allocation7], %s1654_s15, %s1654_s15, %s1655_s16  }
  0x19   : > { %s222_s14 = sshll.u32 %s2065_s2, 4  ;;  %s1657_s9 = smov [#allocation9]   ;;  %s223_s14 = int_to_ptr.hbm [resolvable:$true] %s222_s14 }
  0x1a   : > { %1363 = dma.hbm_to_vmem [thread:$0]  (!%p1757_p10), %s223_s14, 32, %s225_s24, [#allocation7]  }
  0x1b   : > { %s238_s12 = sshll.u32 %s1657_s9, 4  ;;  %s2053_s13 = smov 128   ;;  %s239_s12 = int_to_ptr.vmem [resolvable:$true] %s238_s12 }
  0x1c   : > { %s2054_s7 = smov 8   ;;  %s42_s10 = sadd.s32 1, %s1639_s20 }
  0x1d   : > { %s236_s6 = sshll.u32 %s2066_s3, 4  ;;  %s35_s15 = sadd.s32 1, %s1647_s22  ;;  %s237_s6 = int_to_ptr.hbm [resolvable:$true] %s236_s6 }
  0x1e   : > { %1366 = dma.hbm_to_vmem [thread:$0]  (!%p1757_p10), %s237_s6, 4096, %s239_s12, [#allocation10], %s2053_s13, %s2053_s13, %s2054_s7  }
  0x1f   : > { %p49_p12 = scmp.ne.s32.totalorder %s1639_s20, %s1635_s19  ;;  %p37_p13 = scmp.ge.s32.totalorder %s35_s15, 2 }
  0x20   : > { %p50_p0 = scmp.eq.s32.totalorder %s1651_s23, 0  ;;  %p1378_p5 = scmp.lt.s32.totalorder %s1651_s23, 2 }
  0x21   : > { %p1784_p3 = por %p1730_p2, %p49_p12  ;;  %s2077_s15 = smov (%p37_p13, %s35_s15), 0 }
  0x22   : > { %p1791_p7 = por %p50_p0, %p49_p12  ;;  %s255_s16 = sand.u32 1, %s1639_s20  }
  0x23   : > { %s39_s17 = ssub.s32 %s1647_s22, %s2077_s15  ;;  %s1325_s24 = sshll.u32 %s255_s16, 8 }
  0x24   : > { %p40_p9 = scmp.eq.s32.totalorder %s39_s17, 0  ;;  %s1339_s25 = sshll.u32 %s1647_s22, 8 }
  0x25   : > { %s264_s9 = scalar_lea.hbm %s2047_s0, %s1339_s25  ;;  %s259_s12 = scalar_lea.vmem [#allocation3], %s1325_s24 }
  0x26   : > { %s1800_s27 = scalar_select %p40_p9, %s1639_s20, %s42_s10  }
  0x27   : > { %s267_s13 = sshll.u32 %s259_s12, 4  ;;  %s265_s7 = sshll.u32 %s264_s9, 4  ;;  %s268_s13 = int_to_ptr.vmem [resolvable:$true] %s267_s13  ;;  %s266_s7 = int_to_ptr.hbm [resolvable:$true] %s265_s7 }
  0x28   : > { %p1368_p2 = pnand %p1378_p5, %p1791_p7  ;;  %s256_s1 = scalar_lea.sflag [#allocation4], %s255_s16 }
  0x29   : > { %s2069_s2 = smov 8   ;;  %s2070_s3 = smov 128  }
  0x2a   : > { %1370 = dma.hbm_to_vmem [thread:$0]  (!%p1368_p2), %s266_s7, 4096, %s268_s13, %s256_s1, %s2070_s3, %s2070_s3, %s2069_s2  }
  0x2b   : > { %279 = sbr.rel (%p1749_p8) target bundleno = 604 (0x25c), region = 40  ;;  %s1815_s10 = sand.u32 (!%p1749_p8), 1, %s1635_s19  }
  0x2c   : > { %s1329_s17 = sshll.u32 (!%p1749_p8), %s1815_s10, 8  ;;  %s282_s24 = scalar_lea.sflag (!%p1749_p8), [#allocation4], %s1815_s10 }
  0x2d   : > { %s1821_s11 = scalar_lea.vmem (!%p1749_p8), [#allocation3], %s1329_s17 }
  0x30   : > { %1614 = dma.done.wait (%p1736_p4), %s282_s24, 4096  }
  0x31   : > { %1616 = vsyncadd (%p1736_p4), %s282_s24, 4294963200 }
  0x32   : > { %1618 = dma.done.wait (%p1726_p1), [#allocation7], 4128  }
  0x33   : > { %1620 = vsyncadd (%p1726_p1), [#allocation7], 4294963168 }
  0x34   : > { %1622 = dma.done.wait (%p1726_p1), [#allocation10], 4096  }
  0x35   : > { %1624 = vsyncadd (%p1726_p1), [#allocation10], 4294963200  ;;  %v431_v0 = vld [vmem:[#allocation6 + $0xf0] sm:$0xff]  ;;  %v432_v1 = vld [vmem:[#allocation6 + $0xf8] sm:$0xff]  ;;  %s1915_s3 = scalar_lea.vmem [#allocation11], %s1329_s17  ;;  %s1340_s26 = sshll.u32 %s1643_s21, 8 }
  0x36   : > { %v429_v2 = vld [vmem:[#allocation6 + $0xe0] sm:$0xff]  ;;  %439 = vmatpush.msra.mxu0 %v431_v0  ;;  %552 = vmatpush.msra.mxu1 %v432_v1  ;;  %v430_v3 = vld [vmem:[#allocation6 + $0xe8] sm:$0xff]  ;;  %v427_v4 = vld [vmem:[#allocation6 + $0xd0] sm:$0xff]  ;;  %s1198_s13 = scalar_lea.hbm %s2052_s5, %s1340_s26  ;;  %s1199_s7 = sshll.u32 %s1915_s3, 4  ;;  %s1200_s7 = int_to_ptr.vmem [resolvable:$true] %s1199_s7 }
  0x37   : > { %v428_v5 = vld [vmem:[#allocation6 + $0xd8] sm:$0xff]  ;;  %v425_v6 = vld [vmem:[#allocation6 + $0xc0] sm:$0xff]  ;;  %v426_v7 = vld [vmem:[#allocation6 + $0xc8] sm:$0xff]  ;;  %s1201_s16 = sshll.u32 %s1198_s13, 4  ;;  %s1187_s25 = scalar_lea.sflag [#allocation5], %s1815_s10  ;;  %s1202_s16 = int_to_ptr.hbm [resolvable:$true] %s1201_s16 }
  0x38   : > { %440 = vmatpush.msra.mxu0 %v429_v2  ;;  %553 = vmatpush.msra.mxu1 %v430_v3  ;;  %v423_v8 = vld [vmem:[#allocation6 + $0xb0] sm:$0xff]  ;;  %v424_v9 = vld [vmem:[#allocation6 + $0xb8] sm:$0xff]  ;;  %v421_v10 = vld [vmem:[#allocation6 + $0xa0] sm:$0xff]  ;;  %s1575_s21 = sshra.s32 %s1202_s16, 4  ;;  %s1581_s12 = scalar_lea.hbm %s2052_s5, 512  ;;  %s1576_s21 = int_to_ptr.hbm [resolvable:$true] %s1575_s21 }
  0x39   : > { %v422_v11 = vld [vmem:[#allocation6 + $0xa8] sm:$0xff]  ;;  %v419_v12 = vld [vmem:[#allocation6 + $0x90] sm:$0xff]  ;;  %v420_v13 = vld [vmem:[#allocation6 + $0x98] sm:$0xff]  ;;  %s1577_s30 = scalar_lea.hbm %s1576_s21, 256  ;;  %p1582_p10 = scmp.lt.s32.totalorder %s1576_s21, %s2052_s5 }
  0x3a   : > { %441 = vmatpush.msra.mxu0 %v427_v4  ;;  %554 = vmatpush.msra.mxu1 %v428_v5  ;;  %v417_v14 = vld [vmem:[#allocation6 + $0x80] sm:$0xff]  ;;  %v418_v15 = vld [vmem:[#allocation6 + $0x88] sm:$0xff]  ;;  %v415_v16 = vld [vmem:[#allocation6 + $0x70] sm:$0xff]  ;;  %p1578_p1 = scmp.ne.s32.totalorder %s1576_s21, %s1577_s30  ;;  %p1583_p12 = scmp.lt.s32.totalorder %s1581_s12, %s1577_s30 }
  0x3b   : > { %v416_v17 = vld [vmem:[#allocation6 + $0x78] sm:$0xff]  ;;  %v413_v18 = vld [vmem:[#allocation6 + $0x60] sm:$0xff]  ;;  %v414_v19 = vld [vmem:[#allocation6 + $0x68] sm:$0xff] }
  0x3c   : > { %442 = vmatpush.msra.mxu0 %v425_v6  ;;  %555 = vmatpush.msra.mxu1 %v426_v7  ;;  %v411_v20 = vld [vmem:[#allocation6 + $0x50] sm:$0xff]  ;;  %v412_v21 = vld [vmem:[#allocation6 + $0x58] sm:$0xff]  ;;  %v409_v22 = vld [vmem:[#allocation6 + $0x40] sm:$0xff]  ;;  %p1579_p4 = pnand %p1578_p1, %p1784_p3  ;;  %p1584_p13 = por %p1583_p12, %p1582_p10 }
  0x3d   : > { %v410_v23 = vld [vmem:[#allocation6 + $0x48] sm:$0xff]  ;;  %v407_v24 = vld [vmem:[#allocation6 + $0x30] sm:$0xff]  ;;  %v408_v25 = vld [vmem:[#allocation6 + $0x38] sm:$0xff] }
  0x3e   : > { %443 = vmatpush.msra.mxu0 %v423_v8  ;;  %556 = vmatpush.msra.mxu1 %v424_v9  ;;  %v405_v26 = vld [vmem:[#allocation6 + $0x20] sm:$0xff]  ;;  %v406_v27 = vld [vmem:[#allocation6 + $0x28] sm:$0xff]  ;;  %v403_v28 = vld [vmem:[#allocation6 + $0x10] sm:$0xff]  ;;  %p1580_p8 = pneg %p1579_p4 }
  0x3f   : > { %v404_v29 = vld [vmem:[#allocation6 + $0x18] sm:$0xff]  ;;  %v401_v30 = vld [vmem:[#allocation6] sm:$0xff]  ;;  %v402_v31 = vld [vmem:[#allocation6 + $0x8] sm:$0xff] }
  0x40   : > { %444 = vmatpush.msra.mxu0 %v421_v10  ;;  %557 = vmatpush.msra.mxu1 %v422_v11  ;;  %v369_v32 = vld [vmem:[%s1821_s11] sm:$0xff]  ;;  %v370_v33 = vld [vmem:[%s1821_s11 + $0x8] sm:$0xff]  ;;  %v371_v34 = vld [vmem:[%s1821_s11 + $0x10] sm:$0xff]  ;;  %p1585_p0 = pnand %p1584_p13, %p1580_p8 }
  0x41   : > { %v372_v35 = vld [vmem:[%s1821_s11 + $0x18] sm:$0xff]  ;;  %v373_v36 = vld [vmem:[%s1821_s11 + $0x20] sm:$0xff]  ;;  %v374_v37 = vld [vmem:[%s1821_s11 + $0x28] sm:$0xff] }
  0x42   : > { %445 = vmatpush.msra.mxu0 %v419_v12  ;;  %558 = vmatpush.msra.mxu1 %v420_v13  ;;  %v375_v38 = vld [vmem:[%s1821_s11 + $0x30] sm:$0xff]  ;;  %v376_v39 = vld [vmem:[%s1821_s11 + $0x38] sm:$0xff]  ;;  %v377_v40 = vld [vmem:[%s1821_s11 + $0x40] sm:$0xff] }
  0x43   : > { %v776_v41 = vld [vmem:[#allocation9 + $0x78] sm:$0xff]  ;;  %v775_v43 = vld [vmem:[#allocation9 + $0x70] sm:$0xff]  ;;  %v774_v45 = vld [vmem:[#allocation9 + $0x68] sm:$0xff] }
  0x44   : > { %446 = vmatpush.msra.mxu0 %v417_v14  ;;  %559 = vmatpush.msra.mxu1 %v418_v15  ;;  %v792_v42 = vld [vmem:[#allocation9 + $0xf8] sm:$0xff]  ;;  %v791_v44 = vld [vmem:[#allocation9 + $0xf0] sm:$0xff]  ;;  %v790_v46 = vld [vmem:[#allocation9 + $0xe8] sm:$0xff] }
  0x45   : > { %793 = vmatpush.msra.mxu2 %v776_v41  ;;  %906 = vmatpush.msra.mxu3 %v792_v42  ;;  %v378_v47 = vld [vmem:[%s1821_s11 + $0x48] sm:$0xff]  ;;  %v772_v50 = vld [vmem:[#allocation9 + $0x58] sm:$0xff]  ;;  %v771_v52 = vld [vmem:[#allocation9 + $0x50] sm:$0xff] }
  0x46   : > { %447 = vmatpush.msra.mxu0 %v415_v16  ;;  %560 = vmatpush.msra.mxu1 %v416_v17  ;;  %v773_v48 = vld [vmem:[#allocation9 + $0x60] sm:$0xff]  ;;  %v788_v51 = vld [vmem:[#allocation9 + $0xd8] sm:$0xff]  ;;  %v787_v53 = vld [vmem:[#allocation9 + $0xd0] sm:$0xff] }
  0x47   : > { %794 = vmatpush.msra.mxu2 %v775_v43  ;;  %907 = vmatpush.msra.mxu3 %v791_v44  ;;  %v789_v49 = vld [vmem:[#allocation9 + $0xe0] sm:$0xff]  ;;  %v770_v54 = vld [vmem:[#allocation9 + $0x48] sm:$0xff]  ;;  %v768_v59 = vld [vmem:[#allocation9 + $0x38] sm:$0xff] }
  0x48   : > { %448 = vmatpush.msra.mxu0 %v413_v18  ;;  %561 = vmatpush.msra.mxu1 %v414_v19  ;;  %v786_v55 = vld [vmem:[#allocation9 + $0xc8] sm:$0xff]  ;;  %v769_v57 = vld [vmem:[#allocation9 + $0x40] sm:$0xff]  ;;  %v784_v60 = vld [vmem:[#allocation9 + $0xb8] sm:$0xff] }
  0x49   : > { %795 = vmatpush.msra.mxu2 %v774_v45  ;;  %908 = vmatpush.msra.mxu3 %v790_v46  ;;  %v379_v56 = vld [vmem:[%s1821_s11 + $0x50] sm:$0xff]  ;;  %v785_v58 = vld [vmem:[#allocation9 + $0xc0] sm:$0xff]  ;;  %v380_v1 = vld [vmem:[%s1821_s11 + $0x58] sm:$0xff] }
  0x4a   : > { %449 = vmatpush.msra.mxu0 %v411_v20  ;;  %562 = vmatpush.msra.mxu1 %v412_v21  ;;  %v767_v61 = vld [vmem:[#allocation9 + $0x30] sm:$0xff]  ;;  %v766_v63 = vld [vmem:[#allocation9 + $0x28] sm:$0xff]  ;;  %v765_v2 = vld [vmem:[#allocation9 + $0x20] sm:$0xff] }
  0x4b   : > { %796 = vmatpush.msra.mxu2 %v773_v48  ;;  %909 = vmatpush.msra.mxu3 %v789_v49  ;;  %v783_v62 = vld [vmem:[#allocation9 + $0xb0] sm:$0xff]  ;;  %v782_v0 = vld [vmem:[#allocation9 + $0xa8] sm:$0xff]  ;;  %v781_v3 = vld [vmem:[#allocation9 + $0xa0] sm:$0xff] }
  0x4c   : > { %450 = vmatpush.msra.mxu0 %v409_v22  ;;  %563 = vmatpush.msra.mxu1 %v410_v23  ;;  %v764_v4 = vld [vmem:[#allocation9 + $0x18] sm:$0xff]  ;;  %v763_v6 = vld [vmem:[#allocation9 + $0x10] sm:$0xff]  ;;  %v762_v9 = vld [vmem:[#allocation9 + $0x8] sm:$0xff] }
  0x4d   : > { %797 = vmatpush.msra.mxu2 %v772_v50  ;;  %910 = vmatpush.msra.mxu3 %v788_v51  ;;  %v780_v5 = vld [vmem:[#allocation9 + $0x98] sm:$0xff]  ;;  %v779_v7 = vld [vmem:[#allocation9 + $0x90] sm:$0xff]  ;;  %v778_v10 = vld [vmem:[#allocation9 + $0x88] sm:$0xff] }
  0x4e   : > { %451 = vmatpush.msra.mxu0 %v407_v24  ;;  %564 = vmatpush.msra.mxu1 %v408_v25  ;;  %v381_v8 = vld [vmem:[%s1821_s11 + $0x60] sm:$0xff]  ;;  %v382_v13 = vld [vmem:[%s1821_s11 + $0x68] sm:$0xff]  ;;  %v383_v14 = vld [vmem:[%s1821_s11 + $0x70] sm:$0xff] }
  0x4f   : > { %798 = vmatpush.msra.mxu2 %v771_v52  ;;  %911 = vmatpush.msra.mxu3 %v787_v53  ;;  %v761_v11 = vld [vmem:[#allocation9] sm:$0xff]  ;;  %v384_v15 = vld [vmem:[%s1821_s11 + $0x78] sm:$0xff]  ;;  %v433_v16 = vld [vmem:[#allocation8] sm:$0x3] }
  0x50   : > { %452 = vmatpush.msra.mxu0 %v405_v26  ;;  %565 = vmatpush.msra.mxu1 %v406_v27  ;;  %v777_v12 = vld [vmem:[#allocation9 + $0x80] sm:$0xff]  ;;  %v1851_v17 = vperm.slane %v433_v16, 0  ;;  %v1853_v18 = vperm.slane %v433_v16, 1  ;;  %v388_v42 = vld [vmem:[%s1821_s11 + $0x98] sm:$0xff] }
  0x51   : > { %799 = vmatpush.msra.mxu2 %v770_v54  ;;  %912 = vmatpush.msra.mxu3 %v786_v55  ;;  %v385_v21 = vld [vmem:[%s1821_s11 + $0x80] sm:$0xff] }
  0x52   : > { %453 = vmatpush.msra.mxu0 %v403_v28  ;;  %566 = vmatpush.msra.mxu1 %v404_v29  ;;  %v386_v28 = vld [vmem:[%s1821_s11 + $0x88] sm:$0xff]  ;;  %v389_v49 = vld [vmem:[%s1821_s11 + $0xa0] sm:$0xff] }
  0x53   : > { %800 = vmatpush.msra.mxu2 %v769_v57  ;;  %913 = vmatpush.msra.mxu3 %v785_v58 }
  0x54   : > { %454 = vmatpush.msra.mxu0 %v401_v30  ;;  %567 = vmatpush.msra.mxu1 %v402_v31 }
  0x55   : > { %455 = vmatmul.f32.vlgmr.msra.gmra.mxu0 %v369_v32  ;;  %568 = vmatmul.f32.vlgmr.msra.gmra.mxu1 %v369_v32 }
  0x56   : > { %801 = vmatpush.msra.mxu2 %v768_v59  ;;  %914 = vmatpush.msra.mxu3 %v784_v60 }
  0x58   : > { %802 = vmatpush.msra.mxu2 %v767_v61  ;;  %915 = vmatpush.msra.mxu3 %v783_v62 }
  0x5a   : > { %803 = vmatpush.msra.mxu2 %v766_v63  ;;  %916 = vmatpush.msra.mxu3 %v782_v0  ;;  %v391_v63 = vld [vmem:[%s1821_s11 + $0xb0] sm:$0xff] }
  0x5c   : > { %804 = vmatpush.msra.mxu2 %v765_v2  ;;  %917 = vmatpush.msra.mxu3 %v781_v3 }
  0x5d   : > { %458 = vmatmul.f32.gmra.mxu0 %v370_v33  ;;  %571 = vmatmul.f32.gmra.mxu1 %v370_v33 }
  0x5e   : > { %805 = vmatpush.msra.mxu2 %v764_v4  ;;  %918 = vmatpush.msra.mxu3 %v780_v5 }
  0x60   : > { %806 = vmatpush.msra.mxu2 %v763_v6  ;;  %919 = vmatpush.msra.mxu3 %v779_v7  ;;  %v392_v6 = vld [vmem:[%s1821_s11 + $0xb8] sm:$0xff] }
  0x62   : > { %807 = vmatpush.msra.mxu2 %v762_v9  ;;  %920 = vmatpush.msra.mxu3 %v778_v10 }
  0x64   : > { %808 = vmatpush.msra.mxu2 %v761_v11  ;;  %921 = vmatpush.msra.mxu3 %v777_v12 }
  0x65   : > { %461 = vmatmul.f32.gmra.mxu0 %v371_v34  ;;  %574 = vmatmul.f32.gmra.mxu1 %v371_v34 }
  0x6d   : > { %464 = vmatmul.f32.gmra.mxu0 %v372_v35  ;;  %577 = vmatmul.f32.gmra.mxu1 %v372_v35  ;;  %v387_v35 = vld [vmem:[%s1821_s11 + $0x90] sm:$0xff] }
  0x75   : > { %467 = vmatmul.f32.gmra.mxu0 %v373_v36  ;;  %580 = vmatmul.f32.gmra.mxu1 %v373_v36 }
  0x7d   : > { %470 = vmatmul.f32.gmra.mxu0 %v374_v37  ;;  %583 = vmatmul.f32.gmra.mxu1 %v374_v37 }
  0x85   : > { %473 = vmatmul.f32.gmra.mxu0 %v375_v38  ;;  %586 = vmatmul.f32.gmra.mxu1 %v375_v38 }
  0x8d   : > { %476 = vmatmul.f32.gmra.mxu0 %v376_v39  ;;  %589 = vmatmul.f32.gmra.mxu1 %v376_v39 }
  0x95   : > { %479 = vmatmul.f32.gmra.mxu0 %v377_v40  ;;  %592 = vmatmul.f32.gmra.mxu1 %v377_v40 }
  0x9d   : > { %482 = vmatmul.f32.gmra.mxu0 %v378_v47  ;;  %595 = vmatmul.f32.gmra.mxu1 %v378_v47 }
  0xa5   : > { %485 = vmatmul.f32.gmra.mxu0 %v379_v56  ;;  %598 = vmatmul.f32.gmra.mxu1 %v379_v56  ;;  %v390_v56 = vld [vmem:[%s1821_s11 + $0xa8] sm:$0xff] }
  0xad   : > { %488 = vmatmul.f32.gmra.mxu0 %v380_v1  ;;  %601 = vmatmul.f32.gmra.mxu1 %v380_v1 }
  0xb5   : > { %491 = vmatmul.f32.gmra.mxu0 %v381_v8  ;;  %604 = vmatmul.f32.gmra.mxu1 %v381_v8 }
  0xbd   : > { %494 = vmatmul.f32.gmra.mxu0 %v382_v13  ;;  %607 = vmatmul.f32.gmra.mxu1 %v382_v13  ;;  %v393_v13 = vld [vmem:[%s1821_s11 + $0xc0] sm:$0xff] }
  0xc5   : > { %497 = vmatmul.f32.gmra.mxu0 %v383_v14  ;;  %610 = vmatmul.f32.gmra.mxu1 %v383_v14 }
  0xcd   : > { %500 = vmatmul.f32.gmra.mxu0 %v384_v15  ;;  %613 = vmatmul.f32.gmra.mxu1 %v384_v15 }
  0xd2   : > { %v456_v19 = vpop.f32.mrf.mxu0  ;;  %v569_v20 = vpop.f32.mrf.mxu1 }
  0xd3   : > { %v457_v22 = vadd.f32 %v456_v19, %v1851_v17  ;;  %v570_v23 = vadd.f32 %v569_v20, %v1853_v18 }
  0xd5   : > { %503 = vmatmul.f32.gmra.mxu0 %v385_v21  ;;  %616 = vmatmul.f32.gmra.mxu1 %v385_v21  ;;  %v665_v24 = vmax.f32 %v457_v22, 0.0  ;;  %v666_v25 = vmax.f32 %v570_v23, 0.0  ;;  %v394_v22 = vld [vmem:[%s1821_s11 + $0xc8] sm:$0xff] }
  0xd7   : > { %809 = vmatmul.f32.vlgmr.msra.gmra.mxu2 %v665_v24  ;;  %922 = vmatmul.f32.vlgmr.msra.gmra.mxu3 %v666_v25 }
  0xda   : > { %v459_v26 = vpop.f32.mrf.mxu0  ;;  %v572_v27 = vpop.f32.mrf.mxu1 }
  0xdb   : > { %v460_v29 = vadd.f32 %v459_v26, %v1851_v17  ;;  %v573_v30 = vadd.f32 %v572_v27, %v1853_v18 }
  0xdd   : > { %506 = vmatmul.f32.gmra.mxu0 %v386_v28  ;;  %619 = vmatmul.f32.gmra.mxu1 %v386_v28  ;;  %v667_v31 = vmax.f32 %v460_v29, 0.0  ;;  %v668_v32 = vmax.f32 %v573_v30, 0.0  ;;  %v395_v29 = vld [vmem:[%s1821_s11 + $0xd0] sm:$0xff] }
  0xdf   : > { %812 = vmatmul.f32.gmra.mxu2 %v667_v31  ;;  %925 = vmatmul.f32.gmra.mxu3 %v668_v32 }
  0xe2   : > { %v462_v33 = vpop.f32.mrf.mxu0  ;;  %v575_v34 = vpop.f32.mrf.mxu1 }
  0xe3   : > { %v463_v36 = vadd.f32 %v462_v33, %v1851_v17  ;;  %v576_v37 = vadd.f32 %v575_v34, %v1853_v18 }
  0xe5   : > { %509 = vmatmul.f32.gmra.mxu0 %v387_v35  ;;  %622 = vmatmul.f32.gmra.mxu1 %v387_v35  ;;  %v669_v38 = vmax.f32 %v463_v36, 0.0  ;;  %v670_v39 = vmax.f32 %v576_v37, 0.0  ;;  %v396_v36 = vld [vmem:[%s1821_s11 + $0xd8] sm:$0xff] }
  0xe7   : > { %815 = vmatmul.f32.gmra.mxu2 %v669_v38  ;;  %928 = vmatmul.f32.gmra.mxu3 %v670_v39 }
  0xea   : > { %v465_v40 = vpop.f32.mrf.mxu0  ;;  %v578_v41 = vpop.f32.mrf.mxu1 }
  0xeb   : > { %v466_v43 = vadd.f32 %v465_v40, %v1851_v17  ;;  %v579_v44 = vadd.f32 %v578_v41, %v1853_v18 }
  0xed   : > { %512 = vmatmul.f32.gmra.mxu0 %v388_v42  ;;  %625 = vmatmul.f32.gmra.mxu1 %v388_v42  ;;  %v671_v45 = vmax.f32 %v466_v43, 0.0  ;;  %v672_v46 = vmax.f32 %v579_v44, 0.0  ;;  %v397_v43 = vld [vmem:[%s1821_s11 + $0xe0] sm:$0xff] }
  0xef   : > { %818 = vmatmul.f32.gmra.mxu2 %v671_v45  ;;  %931 = vmatmul.f32.gmra.mxu3 %v672_v46 }
  0xf2   : > { %v468_v47 = vpop.f32.mrf.mxu0  ;;  %v581_v48 = vpop.f32.mrf.mxu1 }
  0xf3   : > { %v469_v50 = vadd.f32 %v468_v47, %v1851_v17  ;;  %v582_v51 = vadd.f32 %v581_v48, %v1853_v18 }
  0xf5   : > { %515 = vmatmul.f32.gmra.mxu0 %v389_v49  ;;  %628 = vmatmul.f32.gmra.mxu1 %v389_v49  ;;  %v673_v52 = vmax.f32 %v469_v50, 0.0  ;;  %v674_v53 = vmax.f32 %v582_v51, 0.0  ;;  %v398_v50 = vld [vmem:[%s1821_s11 + $0xe8] sm:$0xff] }
  0xf7   : > { %821 = vmatmul.f32.gmra.mxu2 %v673_v52  ;;  %934 = vmatmul.f32.gmra.mxu3 %v674_v53 }
  0xfa   : > { %v471_v54 = vpop.f32.mrf.mxu0  ;;  %v584_v55 = vpop.f32.mrf.mxu1 }
  0xfb   : > { %v472_v57 = vadd.f32 %v471_v54, %v1851_v17  ;;  %v585_v58 = vadd.f32 %v584_v55, %v1853_v18 }
  0xfd   : > { %518 = vmatmul.f32.gmra.mxu0 %v390_v56  ;;  %631 = vmatmul.f32.gmra.mxu1 %v390_v56  ;;  %v675_v59 = vmax.f32 %v472_v57, 0.0  ;;  %v676_v60 = vmax.f32 %v585_v58, 0.0  ;;  %v399_v57 = vld [vmem:[%s1821_s11 + $0xf0] sm:$0xff] }
  0xff   : > { %824 = vmatmul.f32.gmra.mxu2 %v675_v59  ;;  %937 = vmatmul.f32.gmra.mxu3 %v676_v60 }
 0x102   : > { %v474_v61 = vpop.f32.mrf.mxu0  ;;  %v587_v62 = vpop.f32.mrf.mxu1 }
 0x103   : > { %v475_v0 = vadd.f32 %v474_v61, %v1851_v17  ;;  %v588_v1 = vadd.f32 %v587_v62, %v1853_v18 }
 0x105   : > { %521 = vmatmul.f32.gmra.mxu0 %v391_v63  ;;  %634 = vmatmul.f32.gmra.mxu1 %v391_v63  ;;  %v677_v2 = vmax.f32 %v475_v0, 0.0  ;;  %v678_v3 = vmax.f32 %v588_v1, 0.0  ;;  %v400_v0 = vld [vmem:[%s1821_s11 + $0xf8] sm:$0xff] }
 0x107   : > { %827 = vmatmul.f32.gmra.mxu2 %v677_v2  ;;  %940 = vmatmul.f32.gmra.mxu3 %v678_v3 }
 0x10a   : > { %v477_v4 = vpop.f32.mrf.mxu0  ;;  %v590_v5 = vpop.f32.mrf.mxu1 }
 0x10b   : > { %v478_v7 = vadd.f32 %v477_v4, %v1851_v17  ;;  %v591_v8 = vadd.f32 %v590_v5, %v1853_v18 }
 0x10d   : > { %524 = vmatmul.f32.gmra.mxu0 %v392_v6  ;;  %637 = vmatmul.f32.gmra.mxu1 %v392_v6  ;;  %v679_v9 = vmax.f32 %v478_v7, 0.0  ;;  %v680_v10 = vmax.f32 %v591_v8, 0.0 }
 0x10f   : > { %830 = vmatmul.f32.gmra.mxu2 %v679_v9  ;;  %943 = vmatmul.f32.gmra.mxu3 %v680_v10 }
 0x112   : > { %v480_v11 = vpop.f32.mrf.mxu0  ;;  %v593_v12 = vpop.f32.mrf.mxu1 }
 0x113   : > { %v481_v14 = vadd.f32 %v480_v11, %v1851_v17  ;;  %v594_v15 = vadd.f32 %v593_v12, %v1853_v18 }
 0x115   : > { %v681_v16 = vmax.f32 %v481_v14, 0.0  ;;  %v682_v19 = vmax.f32 %v594_v15, 0.0  ;;  %527 = vmatmul.f32.gmra.mxu0 %v393_v13  ;;  %640 = vmatmul.f32.gmra.mxu1 %v393_v13  ;;  %v1908_v13 = vld [vmem:[%s2051_s4] ss:$0 sm:$0xff] }
 0x117   : > { %833 = vmatmul.f32.gmra.mxu2 %v681_v16  ;;  %946 = vmatmul.f32.gmra.mxu3 %v682_v19 }
 0x11a   : > { %v483_v20 = vpop.f32.mrf.mxu0  ;;  %v596_v21 = vpop.f32.mrf.mxu1 }
 0x11b   : > { %v484_v23 = vadd.f32 %v483_v20, %v1851_v17  ;;  %v597_v24 = vadd.f32 %v596_v21, %v1853_v18 }
 0x11d   : > { %v683_v25 = vmax.f32 %v484_v23, 0.0  ;;  %v684_v26 = vmax.f32 %v597_v24, 0.0  ;;  %530 = vmatmul.f32.gmra.mxu0 %v394_v22  ;;  %643 = vmatmul.f32.gmra.mxu1 %v394_v22 }
 0x11f   : > { %836 = vmatmul.f32.gmra.mxu2 %v683_v25  ;;  %949 = vmatmul.f32.gmra.mxu3 %v684_v26 }
 0x122   : > { %v486_v27 = vpop.f32.mrf.mxu0  ;;  %v599_v28 = vpop.f32.mrf.mxu1 }
 0x123   : > { %v487_v30 = vadd.f32 %v486_v27, %v1851_v17  ;;  %v600_v31 = vadd.f32 %v599_v28, %v1853_v18 }
 0x125   : > { %v685_v32 = vmax.f32 %v487_v30, 0.0  ;;  %v686_v33 = vmax.f32 %v600_v31, 0.0  ;;  %533 = vmatmul.f32.gmra.mxu0 %v395_v29  ;;  %646 = vmatmul.f32.gmra.mxu1 %v395_v29 }
 0x127   : > { %839 = vmatmul.f32.gmra.mxu2 %v685_v32  ;;  %952 = vmatmul.f32.gmra.mxu3 %v686_v33 }
 0x12a   : > { %v489_v34 = vpop.f32.mrf.mxu0  ;;  %v602_v35 = vpop.f32.mrf.mxu1 }
 0x12b   : > { %v490_v37 = vadd.f32 %v489_v34, %v1851_v17  ;;  %v603_v38 = vadd.f32 %v602_v35, %v1853_v18 }
 0x12d   : > { %v687_v39 = vmax.f32 %v490_v37, 0.0  ;;  %v688_v40 = vmax.f32 %v603_v38, 0.0  ;;  %536 = vmatmul.f32.gmra.mxu0 %v396_v36  ;;  %649 = vmatmul.f32.gmra.mxu1 %v396_v36 }
 0x12f   : > { %842 = vmatmul.f32.gmra.mxu2 %v687_v39  ;;  %955 = vmatmul.f32.gmra.mxu3 %v688_v40 }
 0x132   : > { %v492_v41 = vpop.f32.mrf.mxu0  ;;  %v605_v42 = vpop.f32.mrf.mxu1 }
 0x133   : > { %v493_v44 = vadd.f32 %v492_v41, %v1851_v17  ;;  %v606_v45 = vadd.f32 %v605_v42, %v1853_v18 }
 0x135   : > { %v689_v46 = vmax.f32 %v493_v44, 0.0  ;;  %v690_v47 = vmax.f32 %v606_v45, 0.0  ;;  %539 = vmatmul.f32.gmra.mxu0 %v397_v43  ;;  %652 = vmatmul.f32.gmra.mxu1 %v397_v43 }
 0x137   : > { %845 = vmatmul.f32.gmra.mxu2 %v689_v46  ;;  %958 = vmatmul.f32.gmra.mxu3 %v690_v47 }
 0x13a   : > { %v495_v48 = vpop.f32.mrf.mxu0  ;;  %v608_v49 = vpop.f32.mrf.mxu1 }
 0x13b   : > { %v496_v51 = vadd.f32 %v495_v48, %v1851_v17  ;;  %v609_v52 = vadd.f32 %v608_v49, %v1853_v18 }
 0x13d   : > { %v691_v53 = vmax.f32 %v496_v51, 0.0  ;;  %v692_v54 = vmax.f32 %v609_v52, 0.0  ;;  %542 = vmatmul.f32.gmra.mxu0 %v398_v50  ;;  %655 = vmatmul.f32.gmra.mxu1 %v398_v50 }
 0x13f   : > { %848 = vmatmul.f32.gmra.mxu2 %v691_v53  ;;  %961 = vmatmul.f32.gmra.mxu3 %v692_v54 }
 0x142   : > { %v498_v55 = vpop.f32.mrf.mxu0  ;;  %v611_v56 = vpop.f32.mrf.mxu1 }
 0x143   : > { %v499_v58 = vadd.f32 %v498_v55, %v1851_v17  ;;  %v612_v59 = vadd.f32 %v611_v56, %v1853_v18 }
 0x145   : > { %v693_v60 = vmax.f32 %v499_v58, 0.0  ;;  %v694_v61 = vmax.f32 %v612_v59, 0.0  ;;  %545 = vmatmul.f32.gmra.mxu0 %v399_v57  ;;  %658 = vmatmul.f32.gmra.mxu1 %v399_v57 }
 0x147   : > { %851 = vmatmul.f32.gmra.mxu2 %v693_v60  ;;  %964 = vmatmul.f32.gmra.mxu3 %v694_v61 }
 0x14a   : > { %v501_v62 = vpop.f32.mrf.mxu0  ;;  %v614_v63 = vpop.f32.mrf.mxu1 }
 0x14b   : > { %v502_v1 = vadd.f32 %v501_v62, %v1851_v17  ;;  %v615_v2 = vadd.f32 %v614_v63, %v1853_v18 }
 0x14d   : > { %v695_v3 = vmax.f32 %v502_v1, 0.0  ;;  %v696_v4 = vmax.f32 %v615_v2, 0.0  ;;  %548 = vmatmul.f32.gmra.mxu0 %v400_v0  ;;  %661 = vmatmul.f32.gmra.mxu1 %v400_v0 }
 0x14f   : > { %854 = vmatmul.f32.gmra.mxu2 %v695_v3  ;;  %967 = vmatmul.f32.gmra.mxu3 %v696_v4 }
 0x152   : > { %v504_v5 = vpop.f32.mrf.mxu0  ;;  %v617_v6 = vpop.f32.mrf.mxu1 }
 0x153   : > { %v505_v7 = vadd.f32 %v504_v5, %v1851_v17  ;;  %v618_v8 = vadd.f32 %v617_v6, %v1853_v18 }
 0x155   : > { %v697_v9 = vmax.f32 %v505_v7, 0.0  ;;  %v698_v10 = vmax.f32 %v618_v8, 0.0 }
 0x157   : > { %857 = vmatmul.f32.gmra.mxu2 %v697_v9  ;;  %970 = vmatmul.f32.gmra.mxu3 %v698_v10 }
 0x15a   : > { %v507_v11 = vpop.f32.mrf.mxu0  ;;  %v620_v12 = vpop.f32.mrf.mxu1 }
 0x15b   : > { %v508_v14 = vadd.f32 %v507_v11, %v1851_v17  ;;  %v621_v15 = vadd.f32 %v620_v12, %v1853_v18  ;;  %v810_v16 = vpop.f32.mrf.mxu2  ;;  %v923_v19 = vpop.f32.mrf.mxu3 }
 0x15c   : > { %v924_v20 = vadd.f32 %v923_v19, %v810_v16 }
 0x15d   : > { %v699_v21 = vmax.f32 %v508_v14, 0.0  ;;  %v700_v22 = vmax.f32 %v621_v15, 0.0 }
 0x15e   : > { %v1122_v23 = vadd.f32 %v1908_v13, %v924_v20 }
 0x15f   : > { %860 = vmatmul.f32.gmra.mxu2 %v699_v21  ;;  %973 = vmatmul.f32.gmra.mxu3 %v700_v22 }
 0x160   : > { %1154 = vst [vmem:[%s1915_s3] sm:$0xff] %v1122_v23 }
 0x162   : > { %v510_v24 = vpop.f32.mrf.mxu0  ;;  %v623_v25 = vpop.f32.mrf.mxu1 }
 0x163   : > { %v511_v26 = vadd.f32 %v510_v24, %v1851_v17  ;;  %v624_v27 = vadd.f32 %v623_v25, %v1853_v18  ;;  %v813_v28 = vpop.f32.mrf.mxu2  ;;  %v926_v29 = vpop.f32.mrf.mxu3 }
 0x164   : > { %v927_v30 = vadd.f32 %v926_v29, %v813_v28 }
 0x165   : > { %v701_v31 = vmax.f32 %v511_v26, 0.0  ;;  %v702_v32 = vmax.f32 %v624_v27, 0.0 }
 0x166   : > { %v1123_v33 = vadd.f32 %v1908_v13, %v927_v30 }
 0x167   : > { %863 = vmatmul.f32.gmra.mxu2 %v701_v31  ;;  %976 = vmatmul.f32.gmra.mxu3 %v702_v32 }
 0x168   : > { %1155 = vst [vmem:[%s1915_s3 + $0x8] sm:$0xff] %v1123_v33 }
 0x16a   : > { %v513_v34 = vpop.f32.mrf.mxu0  ;;  %v626_v35 = vpop.f32.mrf.mxu1 }
 0x16b   : > { %v514_v36 = vadd.f32 %v513_v34, %v1851_v17  ;;  %v627_v37 = vadd.f32 %v626_v35, %v1853_v18  ;;  %v816_v38 = vpop.f32.mrf.mxu2  ;;  %v929_v39 = vpop.f32.mrf.mxu3 }
 0x16c   : > { %v930_v40 = vadd.f32 %v929_v39, %v816_v38 }
 0x16d   : > { %v703_v41 = vmax.f32 %v514_v36, 0.0  ;;  %v704_v42 = vmax.f32 %v627_v37, 0.0 }
 0x16e   : > { %v1124_v43 = vadd.f32 %v1908_v13, %v930_v40 }
 0x16f   : > { %866 = vmatmul.f32.gmra.mxu2 %v703_v41  ;;  %979 = vmatmul.f32.gmra.mxu3 %v704_v42 }
 0x170   : > { %1156 = vst [vmem:[%s1915_s3 + $0x10] sm:$0xff] %v1124_v43 }
 0x172   : > { %v516_v44 = vpop.f32.mrf.mxu0  ;;  %v629_v45 = vpop.f32.mrf.mxu1 }
 0x173   : > { %v517_v46 = vadd.f32 %v516_v44, %v1851_v17  ;;  %v630_v47 = vadd.f32 %v629_v45, %v1853_v18  ;;  %v819_v48 = vpop.f32.mrf.mxu2  ;;  %v932_v49 = vpop.f32.mrf.mxu3 }
 0x174   : > { %v933_v50 = vadd.f32 %v932_v49, %v819_v48 }
 0x175   : > { %v705_v51 = vmax.f32 %v517_v46, 0.0  ;;  %v706_v52 = vmax.f32 %v630_v47, 0.0 }
 0x176   : > { %v1125_v53 = vadd.f32 %v1908_v13, %v933_v50 }
 0x177   : > { %869 = vmatmul.f32.gmra.mxu2 %v705_v51  ;;  %982 = vmatmul.f32.gmra.mxu3 %v706_v52 }
 0x178   : > { %1157 = vst [vmem:[%s1915_s3 + $0x18] sm:$0xff] %v1125_v53 }
 0x17a   : > { %v519_v54 = vpop.f32.mrf.mxu0  ;;  %v632_v55 = vpop.f32.mrf.mxu1 }
 0x17b   : > { %v520_v56 = vadd.f32 %v519_v54, %v1851_v17  ;;  %v633_v57 = vadd.f32 %v632_v55, %v1853_v18  ;;  %v822_v58 = vpop.f32.mrf.mxu2  ;;  %v935_v59 = vpop.f32.mrf.mxu3 }
 0x17c   : > { %v936_v60 = vadd.f32 %v935_v59, %v822_v58 }
 0x17d   : > { %v707_v61 = vmax.f32 %v520_v56, 0.0  ;;  %v708_v62 = vmax.f32 %v633_v57, 0.0 }
 0x17e   : > { %v1126_v63 = vadd.f32 %v1908_v13, %v936_v60 }
 0x17f   : > { %872 = vmatmul.f32.gmra.mxu2 %v707_v61  ;;  %985 = vmatmul.f32.gmra.mxu3 %v708_v62 }
 0x180   : > { %1158 = vst [vmem:[%s1915_s3 + $0x20] sm:$0xff] %v1126_v63 }
 0x182   : > { %v522_v0 = vpop.f32.mrf.mxu0  ;;  %v635_v1 = vpop.f32.mrf.mxu1 }
 0x183   : > { %v523_v2 = vadd.f32 %v522_v0, %v1851_v17  ;;  %v636_v3 = vadd.f32 %v635_v1, %v1853_v18  ;;  %v825_v4 = vpop.f32.mrf.mxu2  ;;  %v938_v5 = vpop.f32.mrf.mxu3 }
 0x184   : > { %v939_v6 = vadd.f32 %v938_v5, %v825_v4 }
 0x185   : > { %v709_v7 = vmax.f32 %v523_v2, 0.0  ;;  %v710_v8 = vmax.f32 %v636_v3, 0.0 }
 0x186   : > { %v1127_v9 = vadd.f32 %v1908_v13, %v939_v6 }
 0x187   : > { %875 = vmatmul.f32.gmra.mxu2 %v709_v7  ;;  %988 = vmatmul.f32.gmra.mxu3 %v710_v8 }
 0x188   : > { %1159 = vst [vmem:[%s1915_s3 + $0x28] sm:$0xff] %v1127_v9 }
 0x18a   : > { %v525_v10 = vpop.f32.mrf.mxu0  ;;  %v638_v11 = vpop.f32.mrf.mxu1 }
 0x18b   : > { %v526_v12 = vadd.f32 %v525_v10, %v1851_v17  ;;  %v639_v14 = vadd.f32 %v638_v11, %v1853_v18  ;;  %v828_v15 = vpop.f32.mrf.mxu2  ;;  %v941_v16 = vpop.f32.mrf.mxu3 }
 0x18c   : > { %v942_v19 = vadd.f32 %v941_v16, %v828_v15 }
 0x18d   : > { %v711_v20 = vmax.f32 %v526_v12, 0.0  ;;  %v712_v21 = vmax.f32 %v639_v14, 0.0 }
 0x18e   : > { %v1128_v22 = vadd.f32 %v1908_v13, %v942_v19 }
 0x18f   : > { %878 = vmatmul.f32.gmra.mxu2 %v711_v20  ;;  %991 = vmatmul.f32.gmra.mxu3 %v712_v21 }
 0x190   : > { %1160 = vst [vmem:[%s1915_s3 + $0x30] sm:$0xff] %v1128_v22 }
 0x192   : > { %v528_v23 = vpop.f32.mrf.mxu0  ;;  %v641_v24 = vpop.f32.mrf.mxu1 }
 0x193   : > { %v529_v25 = vadd.f32 %v528_v23, %v1851_v17  ;;  %v642_v26 = vadd.f32 %v641_v24, %v1853_v18  ;;  %v831_v27 = vpop.f32.mrf.mxu2  ;;  %v944_v28 = vpop.f32.mrf.mxu3 }
 0x194   : > { %v945_v29 = vadd.f32 %v944_v28, %v831_v27 }
 0x195   : > { %v713_v30 = vmax.f32 %v529_v25, 0.0  ;;  %v714_v31 = vmax.f32 %v642_v26, 0.0 }
 0x196   : > { %v1129_v32 = vadd.f32 %v1908_v13, %v945_v29 }
 0x197   : > { %881 = vmatmul.f32.gmra.mxu2 %v713_v30  ;;  %994 = vmatmul.f32.gmra.mxu3 %v714_v31 }
 0x198   : > { %1161 = vst [vmem:[%s1915_s3 + $0x38] sm:$0xff] %v1129_v32 }
 0x19a   : > { %v531_v33 = vpop.f32.mrf.mxu0  ;;  %v644_v34 = vpop.f32.mrf.mxu1 }
 0x19b   : > { %v532_v35 = vadd.f32 %v531_v33, %v1851_v17  ;;  %v645_v36 = vadd.f32 %v644_v34, %v1853_v18  ;;  %v834_v37 = vpop.f32.mrf.mxu2  ;;  %v947_v38 = vpop.f32.mrf.mxu3 }
 0x19c   : > { %v948_v39 = vadd.f32 %v947_v38, %v834_v37 }
 0x19d   : > { %v715_v40 = vmax.f32 %v532_v35, 0.0  ;;  %v716_v41 = vmax.f32 %v645_v36, 0.0 }
 0x19e   : > { %v1130_v42 = vadd.f32 %v1908_v13, %v948_v39 }
 0x19f   : > { %884 = vmatmul.f32.gmra.mxu2 %v715_v40  ;;  %997 = vmatmul.f32.gmra.mxu3 %v716_v41 }
 0x1a0   : > { %1162 = vst [vmem:[%s1915_s3 + $0x40] sm:$0xff] %v1130_v42 }
 0x1a2   : > { %v534_v43 = vpop.f32.mrf.mxu0  ;;  %v647_v44 = vpop.f32.mrf.mxu1 }
 0x1a3   : > { %v535_v45 = vadd.f32 %v534_v43, %v1851_v17  ;;  %v648_v46 = vadd.f32 %v647_v44, %v1853_v18  ;;  %v837_v47 = vpop.f32.mrf.mxu2  ;;  %v950_v48 = vpop.f32.mrf.mxu3 }
 0x1a4   : > { %v951_v49 = vadd.f32 %v950_v48, %v837_v47 }
 0x1a5   : > { %v717_v50 = vmax.f32 %v535_v45, 0.0  ;;  %v718_v51 = vmax.f32 %v648_v46, 0.0 }
 0x1a6   : > { %v1131_v52 = vadd.f32 %v1908_v13, %v951_v49 }
 0x1a7   : > { %887 = vmatmul.f32.gmra.mxu2 %v717_v50  ;;  %1000 = vmatmul.f32.gmra.mxu3 %v718_v51 }
 0x1a8   : > { %1163 = vst [vmem:[%s1915_s3 + $0x48] sm:$0xff] %v1131_v52 }
 0x1aa   : > { %v537_v53 = vpop.f32.mrf.mxu0  ;;  %v650_v54 = vpop.f32.mrf.mxu1 }
 0x1ab   : > { %v538_v55 = vadd.f32 %v537_v53, %v1851_v17  ;;  %v651_v56 = vadd.f32 %v650_v54, %v1853_v18  ;;  %v840_v57 = vpop.f32.mrf.mxu2  ;;  %v953_v58 = vpop.f32.mrf.mxu3 }
 0x1ac   : > { %v954_v59 = vadd.f32 %v953_v58, %v840_v57 }
 0x1ad   : > { %v719_v60 = vmax.f32 %v538_v55, 0.0  ;;  %v720_v61 = vmax.f32 %v651_v56, 0.0 }
 0x1ae   : > { %v1132_v62 = vadd.f32 %v1908_v13, %v954_v59 }
 0x1af   : > { %890 = vmatmul.f32.gmra.mxu2 %v719_v60  ;;  %1003 = vmatmul.f32.gmra.mxu3 %v720_v61 }
 0x1b0   : > { %1164 = vst [vmem:[%s1915_s3 + $0x50] sm:$0xff] %v1132_v62 }
 0x1b2   : > { %v540_v63 = vpop.f32.mrf.mxu0  ;;  %v653_v0 = vpop.f32.mrf.mxu1 }
 0x1b3   : > { %v541_v1 = vadd.f32 %v540_v63, %v1851_v17  ;;  %v654_v2 = vadd.f32 %v653_v0, %v1853_v18  ;;  %v843_v3 = vpop.f32.mrf.mxu2  ;;  %v956_v4 = vpop.f32.mrf.mxu3 }
 0x1b4   : > { %v957_v5 = vadd.f32 %v956_v4, %v843_v3 }
 0x1b5   : > { %v721_v6 = vmax.f32 %v541_v1, 0.0  ;;  %v722_v7 = vmax.f32 %v654_v2, 0.0 }
 0x1b6   : > { %v1133_v8 = vadd.f32 %v1908_v13, %v957_v5 }
 0x1b7   : > { %893 = vmatmul.f32.gmra.mxu2 %v721_v6  ;;  %1006 = vmatmul.f32.gmra.mxu3 %v722_v7 }
 0x1b8   : > { %1165 = vst [vmem:[%s1915_s3 + $0x58] sm:$0xff] %v1133_v8 }
 0x1ba   : > { %v543_v9 = vpop.f32.mrf.mxu0  ;;  %v656_v10 = vpop.f32.mrf.mxu1 }
 0x1bb   : > { %v544_v11 = vadd.f32 %v543_v9, %v1851_v17  ;;  %v657_v12 = vadd.f32 %v656_v10, %v1853_v18  ;;  %v846_v14 = vpop.f32.mrf.mxu2  ;;  %v959_v15 = vpop.f32.mrf.mxu3 }
 0x1bc   : > { %v960_v16 = vadd.f32 %v959_v15, %v846_v14 }
 0x1bd   : > { %v723_v19 = vmax.f32 %v544_v11, 0.0  ;;  %v724_v20 = vmax.f32 %v657_v12, 0.0 }
 0x1be   : > { %v1134_v21 = vadd.f32 %v1908_v13, %v960_v16 }
 0x1bf   : > { %896 = vmatmul.f32.gmra.mxu2 %v723_v19  ;;  %1009 = vmatmul.f32.gmra.mxu3 %v724_v20 }
 0x1c0   : > { %1166 = vst [vmem:[%s1915_s3 + $0x60] sm:$0xff] %v1134_v21 }
 0x1c2   : > { %v546_v22 = vpop.f32.mrf.mxu0  ;;  %v659_v23 = vpop.f32.mrf.mxu1 }
 0x1c3   : > { %v547_v24 = vadd.f32 %v546_v22, %v1851_v17  ;;  %v660_v25 = vadd.f32 %v659_v23, %v1853_v18  ;;  %v849_v26 = vpop.f32.mrf.mxu2  ;;  %v962_v27 = vpop.f32.mrf.mxu3 }
 0x1c4   : > { %v963_v28 = vadd.f32 %v962_v27, %v849_v26 }
 0x1c5   : > { %v725_v29 = vmax.f32 %v547_v24, 0.0  ;;  %v726_v30 = vmax.f32 %v660_v25, 0.0 }
 0x1c6   : > { %v1135_v31 = vadd.f32 %v1908_v13, %v963_v28 }
 0x1c7   : > { %899 = vmatmul.f32.gmra.mxu2 %v725_v29  ;;  %1012 = vmatmul.f32.gmra.mxu3 %v726_v30 }
 0x1c8   : > { %1167 = vst [vmem:[%s1915_s3 + $0x68] sm:$0xff] %v1135_v31 }
 0x1ca   : > { %v549_v32 = vpop.f32.mrf.mxu0  ;;  %v662_v33 = vpop.f32.mrf.mxu1 }
 0x1cb   : > { %v550_v34 = vadd.f32 %v549_v32, %v1851_v17  ;;  %v663_v35 = vadd.f32 %v662_v33, %v1853_v18  ;;  %v852_v36 = vpop.f32.mrf.mxu2  ;;  %v965_v37 = vpop.f32.mrf.mxu3 }
 0x1cc   : > { %v966_v38 = vadd.f32 %v965_v37, %v852_v36 }
 0x1cd   : > { %v727_v39 = vmax.f32 %v550_v34, 0.0  ;;  %v728_v40 = vmax.f32 %v663_v35, 0.0 }
 0x1ce   : > { %v1136_v41 = vadd.f32 %v1908_v13, %v966_v38 }
 0x1cf   : > { %902 = vmatmul.f32.gmra.mxu2 %v727_v39  ;;  %1015 = vmatmul.f32.gmra.mxu3 %v728_v40 }
 0x1d0   : > { %1168 = vst [vmem:[%s1915_s3 + $0x70] sm:$0xff] %v1136_v41 }
 0x1d3   : > { %v855_v42 = vpop.f32.mrf.mxu2  ;;  %v968_v43 = vpop.f32.mrf.mxu3 }
 0x1d4   : > { %v969_v44 = vadd.f32 %v968_v43, %v855_v42 }
 0x1d6   : > { %v1137_v45 = vadd.f32 %v1908_v13, %v969_v44 }
 0x1d8   : > { %1169 = vst [vmem:[%s1915_s3 + $0x78] sm:$0xff] %v1137_v45 }
 0x1db   : > { %v858_v17 = vpop.f32.mrf.mxu2  ;;  %v971_v18 = vpop.f32.mrf.mxu3 }
 0x1dc   : > { %v972_v46 = vadd.f32 %v971_v18, %v858_v17 }
 0x1de   : > { %v1138_v47 = vadd.f32 %v1908_v13, %v972_v46 }
 0x1e0   : > { %1170 = vst [vmem:[%s1915_s3 + $0x80] sm:$0xff] %v1138_v47 }
 0x1e3   : > { %v861_v48 = vpop.f32.mrf.mxu2  ;;  %v974_v49 = vpop.f32.mrf.mxu3 }
 0x1e4   : > { %v975_v50 = vadd.f32 %v974_v49, %v861_v48 }
 0x1e6   : > { %v1139_v51 = vadd.f32 %v1908_v13, %v975_v50 }
 0x1e8   : > { %1171 = vst [vmem:[%s1915_s3 + $0x88] sm:$0xff] %v1139_v51 }
 0x1eb   : > { %v864_v52 = vpop.f32.mrf.mxu2  ;;  %v977_v53 = vpop.f32.mrf.mxu3 }
 0x1ec   : > { %v978_v54 = vadd.f32 %v977_v53, %v864_v52 }
 0x1ee   : > { %v1140_v55 = vadd.f32 %v1908_v13, %v978_v54 }
 0x1f0   : > { %1172 = vst [vmem:[%s1915_s3 + $0x90] sm:$0xff] %v1140_v55 }
 0x1f3   : > { %v867_v56 = vpop.f32.mrf.mxu2  ;;  %v980_v57 = vpop.f32.mrf.mxu3 }
 0x1f4   : > { %v981_v58 = vadd.f32 %v980_v57, %v867_v56 }
 0x1f6   : > { %v1141_v59 = vadd.f32 %v1908_v13, %v981_v58 }
 0x1f8   : > { %1173 = vst [vmem:[%s1915_s3 + $0x98] sm:$0xff] %v1141_v59 }
 0x1fb   : > { %v870_v60 = vpop.f32.mrf.mxu2  ;;  %v983_v61 = vpop.f32.mrf.mxu3 }
 0x1fc   : > { %v984_v62 = vadd.f32 %v983_v61, %v870_v60 }
 0x1fe   : > { %v1142_v63 = vadd.f32 %v1908_v13, %v984_v62 }
 0x200   : > { %1174 = vst [vmem:[%s1915_s3 + $0xa0] sm:$0xff] %v1142_v63 }
 0x203   : > { %v873_v0 = vpop.f32.mrf.mxu2  ;;  %v986_v1 = vpop.f32.mrf.mxu3 }
 0x204   : > { %v987_v2 = vadd.f32 %v986_v1, %v873_v0 }
 0x206   : > { %v1143_v3 = vadd.f32 %v1908_v13, %v987_v2 }
 0x208   : > { %1175 = vst [vmem:[%s1915_s3 + $0xa8] sm:$0xff] %v1143_v3 }
 0x20b   : > { %v876_v4 = vpop.f32.mrf.mxu2  ;;  %v989_v5 = vpop.f32.mrf.mxu3 }
 0x20c   : > { %v990_v6 = vadd.f32 %v989_v5, %v876_v4 }
 0x20e   : > { %v1144_v7 = vadd.f32 %v1908_v13, %v990_v6 }
 0x210   : > { %1176 = vst [vmem:[%s1915_s3 + $0xb0] sm:$0xff] %v1144_v7 }
 0x213   : > { %v879_v8 = vpop.f32.mrf.mxu2  ;;  %v992_v9 = vpop.f32.mrf.mxu3 }
 0x214   : > { %v993_v10 = vadd.f32 %v992_v9, %v879_v8 }
 0x216   : > { %v1145_v11 = vadd.f32 %v1908_v13, %v993_v10 }
 0x218   : > { %1177 = vst [vmem:[%s1915_s3 + $0xb8] sm:$0xff] %v1145_v11 }
 0x21b   : > { %v882_v12 = vpop.f32.mrf.mxu2  ;;  %v995_v14 = vpop.f32.mrf.mxu3 }
 0x21c   : > { %v996_v15 = vadd.f32 %v995_v14, %v882_v12 }
 0x21e   : > { %v1146_v16 = vadd.f32 %v1908_v13, %v996_v15 }
 0x220   : > { %1178 = vst [vmem:[%s1915_s3 + $0xc0] sm:$0xff] %v1146_v16 }
 0x223   : > { %v885_v19 = vpop.f32.mrf.mxu2  ;;  %v998_v20 = vpop.f32.mrf.mxu3 }
 0x224   : > { %v999_v21 = vadd.f32 %v998_v20, %v885_v19 }
 0x226   : > { %v1147_v22 = vadd.f32 %v1908_v13, %v999_v21 }
 0x228   : > { %1179 = vst [vmem:[%s1915_s3 + $0xc8] sm:$0xff] %v1147_v22 }
 0x22b   : > { %v888_v23 = vpop.f32.mrf.mxu2  ;;  %v1001_v24 = vpop.f32.mrf.mxu3 }
 0x22c   : > { %v1002_v25 = vadd.f32 %v1001_v24, %v888_v23 }
 0x22e   : > { %v1148_v26 = vadd.f32 %v1908_v13, %v1002_v25 }
 0x230   : > { %1180 = vst [vmem:[%s1915_s3 + $0xd0] sm:$0xff] %v1148_v26 }
 0x233   : > { %v891_v27 = vpop.f32.mrf.mxu2  ;;  %v1004_v28 = vpop.f32.mrf.mxu3 }
 0x234   : > { %v1005_v29 = vadd.f32 %v1004_v28, %v891_v27 }
 0x236   : > { %v1149_v30 = vadd.f32 %v1908_v13, %v1005_v29 }
 0x238   : > { %1181 = vst [vmem:[%s1915_s3 + $0xd8] sm:$0xff] %v1149_v30 }
 0x23b   : > { %v894_v31 = vpop.f32.mrf.mxu2  ;;  %v1007_v32 = vpop.f32.mrf.mxu3 }
 0x23c   : > { %v1008_v33 = vadd.f32 %v1007_v32, %v894_v31 }
 0x23e   : > { %v1150_v34 = vadd.f32 %v1908_v13, %v1008_v33 }
 0x240   : > { %1182 = vst [vmem:[%s1915_s3 + $0xe0] sm:$0xff] %v1150_v34 }
 0x243   : > { %v897_v35 = vpop.f32.mrf.mxu2  ;;  %v1010_v36 = vpop.f32.mrf.mxu3 }
 0x244   : > { %v1011_v37 = vadd.f32 %v1010_v36, %v897_v35 }
 0x246   : > { %v1151_v38 = vadd.f32 %v1908_v13, %v1011_v37 }
 0x248   : > { %1183 = vst [vmem:[%s1915_s3 + $0xe8] sm:$0xff] %v1151_v38 }
 0x24b   : > { %v900_v39 = vpop.f32.mrf.mxu2  ;;  %v1013_v40 = vpop.f32.mrf.mxu3 }
 0x24c   : > { %v1014_v41 = vadd.f32 %v1013_v40, %v900_v39 }
 0x24e   : > { %v1152_v42 = vadd.f32 %v1908_v13, %v1014_v41 }
 0x250   : > { %1184 = vst [vmem:[%s1915_s3 + $0xf0] sm:$0xff] %v1152_v42 }
 0x253   : > { %v903_v43 = vpop.f32.mrf.mxu2  ;;  %v1016_v44 = vpop.f32.mrf.mxu3 }
 0x254   : > { %v1017_v45 = vadd.f32 %v1016_v44, %v903_v43 }
 0x256   : > { %v1153_v17 = vadd.f32 %v1908_v13, %v1017_v45 }
 0x258   : > { %1185 = vst [vmem:[%s1915_s3 + $0xf8] sm:$0xff] %v1153_v17 }
 0x259   : > { %1588 = shalt.err (!%p1585_p0)
}
 0x25a   : > { %s1660_s10 = smov 128   ;;  %s1661_s11 = smov 8  }
 0x25b   : > { %1355 = dma.vmem_to_hbm [thread:$0]  (%p1784_p3), %s1200_s7, 4096, %s1202_s16, %s1187_s25, %s1660_s10, %s1660_s10, %s1661_s11  }
 0x25c PF: > { %s1216_s1 = sand.u32 1, %s1631_s18   ;;  %p1372_p5 = pnand %p1324_p11, %p1741_p6 }
 0x25d   : > { %s1217_s2 = scalar_lea.sflag [#allocation5], %s1216_s1 }
 0x25e   : > { %p1373_p7 = pneg %p1372_p5 }
 0x260   : > { %1626 = dma.done.wait (%p1373_p7), %s1217_s2, 4096  }
 0x261   : > { %1628 = vsyncadd (%p1373_p7), %s1217_s2, 4294963200  ;;  %s23_s23 = sadd.s32 1, %s1651_s23   ;;  %s2071_s18 = smov %s1635_s19 }
 0x262   : > { %p20_p9 = scmp.ge.s32.totalorder %s23_s23, 4   ;;  %s2072_s19 = smov %s1639_s20 }
 0x263   : > { %s2073_s20 = smov %s1800_s27  ;;  %s2074_s21 = smov %s1647_s22 }
 0x264   : > { %s2075_s22 = smov %s2077_s15  ;;  %22 = sbr.rel (!%p20_p9) target bundleno = 12 (0xc), region = 108 }
 0x269   :  { %1223 = vsyncpa [#allocation4], 1 }
 0x26a   :  { %1225 = vsyncpa [#allocation4 + $0x1], 1 }
 0x26b   :  { %1226 = vsyncpa [#allocation7], 1 }
 0x26c   :  { %1227 = vsyncpa [#allocation10], 1 }
 0x26d   :  { %1228 = vsyncpa [#allocation5], 1 }
 0x26e   :  { %1230 = vsyncpa [#allocation5 + $0x1], 1 }

</bundles_post_ra>
